<compile_context>
chip_gen: v7x
topology: tpu7x:2x2x1
jax: 0.10.0
libtpu: 0.0.40
codegen_flags: <defaults>
</compile_context>

<pallas_src>
import functools
import math

import jax
import jax.numpy as jnp
from jax import lax
from jax.experimental import pallas as pl
from jax.experimental.pallas import tpu as pltpu


def _layernorm(v, w, b, eps=1e-5):
    # f32 statistics (biased variance, matches nn.LayerNorm).
    mu = jnp.mean(v, axis=-1, keepdims=True)
    var = jnp.mean((v - mu) ** 2, axis=-1, keepdims=True)
    return (v - mu) * lax.rsqrt(var + eps) * w + b


def _gelu_exact(v):
    # PyTorch nn.GELU() default ('none') = exact erf-based GELU (accuracy-gated: keep exact).
    return 0.5 * v * (1.0 + lax.erf(v * (1.0 / math.sqrt(2.0))))


def vit_block_kernel(num_heads,
                     x_ref,
                     ln1w_ref, ln1b_ref,
                     wqkv_ref, bqkv_ref,      # pre-transposed in_proj: (D, 3D) bf16, (1, 3D) f32
                     wout_ref, bout_ref,      # pre-transposed out_proj: (D, D) bf16, (1, D) f32
                     ln2w_ref, ln2b_ref,
                     wfc1_ref, bfc1_ref,      # pre-transposed fc1: (D, Dh) bf16, (1, Dh) f32
                     wfc2_ref, bfc2_ref,      # pre-transposed fc2: (Dh, D) bf16, (1, D) f32
                     o_ref):
    x = x_ref[...]                            # (S, D) f32 — batch dim squeezed by BlockSpec
    S, D = x.shape
    dh = D // num_heads
    scale = 1.0 / math.sqrt(dh)
    bf16 = jnp.bfloat16

    # ---------------- attention branch ----------------
    h = _layernorm(x, ln1w_ref[...], ln1b_ref[...])                     # f32
    qkv = jnp.dot(h.astype(bf16), wqkv_ref[...],
                  preferred_element_type=jnp.float32) + bqkv_ref[...]   # (S, 3D) f32
    q = qkv[:, 0 * D:1 * D]
    k = qkv[:, 1 * D:2 * D]
    v = qkv[:, 2 * D:3 * D]

    # Multi-head attention with the output projection fused into the head loop:
    # no concatenation / head re-layout is ever materialized.
    nt_dims = (((1,), (1,)), ((), ()))        # contract last dims: A @ B^T without a transpose op
    attn = jnp.zeros((S, D), jnp.float32)
    for hd in range(num_heads):
        sl = slice(hd * dh, (hd + 1) * dh)
        qh = q[:, sl].astype(bf16)            # (S, dh)
        kh = k[:, sl].astype(bf16)
        vh = v[:, sl].astype(bf16)
        s = lax.dot_general(qh, kh, nt_dims,
                            preferred_element_type=jnp.float32) * scale  # (S, S) f32
        s = s - jnp.max(s, axis=-1, keepdims=True)
        p = jnp.exp(s)
        p = p * pl.reciprocal(jnp.sum(p, axis=-1, keepdims=True), approx=True)
        ctx = jnp.dot(p.astype(bf16), vh,
                      preferred_element_type=jnp.float32)                # (S, dh) f32
        attn = attn + jnp.dot(ctx.astype(bf16), wout_ref[sl, :],
                              preferred_element_type=jnp.float32)        # (S, D) f32
    attn = attn + bout_ref[...]
    # TODO(synk): MHA attention-dropout and the post-attn nn.Dropout are identity at inference.
    x1 = x + attn

    # ---------------- MLP branch ----------------
    h2 = _layernorm(x1, ln2w_ref[...], ln2b_ref[...])
    m = jnp.dot(h2.astype(bf16), wfc1_ref[...],
                preferred_element_type=jnp.float32) + bfc1_ref[...]      # (S, Dh) f32
    m = _gelu_exact(m)
    m = jnp.dot(m.astype(bf16), wfc2_ref[...],
                preferred_element_type=jnp.float32) + bfc2_ref[...]      # (S, D) f32
    o_ref[...] = (x1 + m).astype(o_ref.dtype)


def vit_block(x, params, num_heads, *, matmul_dtype=jnp.bfloat16):
    B, S, D = x.shape
    dh_mlp = params["fc1_w"].shape[0]

    # One-time wrapper-side prep: pre-transpose weight matrices and cast MXU operands to
    # bf16.  LayerNorm params and biases stay f32 (added to f32 accumulators / VPU math).
    prepped = [
        params["ln1_w"], params["ln1_b"],
        jnp.asarray(params["in_proj_w"].T, matmul_dtype),   # (D, 3D)
        params["in_proj_b"],
        jnp.asarray(params["out_proj_w"].T, matmul_dtype),  # (D, D)
        params["out_proj_b"],
        params["ln2_w"], params["ln2_b"],
        jnp.asarray(params["fc1_w"].T, matmul_dtype),       # (D, Dh)
        params["fc1_b"],
        jnp.asarray(params["fc2_w"].T, matmul_dtype),       # (Dh, D)
        params["fc2_b"],
    ]

    in_specs = [pl.BlockSpec((pl.Squeezed(), S, D), lambda b: (b, 0, 0))]
    for p in prepped:
        # Full weight resident in VMEM; constant index map -> never re-fetched across B.
        in_specs.append(pl.BlockSpec(p.shape, lambda b, n=p.ndim: (0,) * n))

    # Scoped-VMEM budget: double-buffered weights + x/out blocks + f32 intermediates,
    # 2x headroom, clamped to [16 MiB, 64 MiB] (valid on v5e/v6e/v7x).
    weight_bytes = sum(int(p.size) * p.dtype.itemsize for p in prepped)
    io_bytes = 2 * S * D * x.dtype.itemsize
    act_bytes = 4 * S * (3 * D + 8 * D + 2 * dh_mlp) + 4 * 2 * S * S
    vmem_limit = int(min(64 * 2 ** 20,
                         max(2 * (2 * weight_bytes + 2 * io_bytes + act_bytes),
                             16 * 2 ** 20)))

    return pl.pallas_call(
        functools.partial(vit_block_kernel, num_heads),
        out_shape=jax.ShapeDtypeStruct((B, S, D), x.dtype),
        grid_spec=pltpu.PrefetchScalarGridSpec(
            num_scalar_prefetch=0,
            grid=(B,),
            in_specs=in_specs,
            out_specs=pl.BlockSpec((pl.Squeezed(), S, D), lambda b: (b, 0, 0)),
        ),
        compiler_params=pltpu.CompilerParams(
            dimension_semantics=("parallel",),
            vmem_limit_bytes=vmem_limit,
        ),
    )(x, *prepped)


def vit_block_reference(x, params, num_heads):
    """Pure-JAX f32 reference mirroring PyTorch ViTBlock.forward (eval mode)."""
    B, S, D = x.shape
    dh = D // num_heads

    def ln(v, w, b):
        mu = jnp.mean(v, axis=-1, keepdims=True)
        var = jnp.mean((v - mu) ** 2, axis=-1, keepdims=True)
        return (v - mu) / jnp.sqrt(var + 1e-5) * w[0] + b[0]

    h = ln(x, params["ln1_w"], params["ln1_b"])
    qkv = jnp.einsum("bsd,ed->bse", h, params["in_proj_w"]) + params["in_proj_b"][0]
    q, k, v = qkv[..., :D], qkv[..., D:2 * D], qkv[..., 2 * D:]
    q = q.reshape(B, S, num_heads, dh).transpose(0, 2, 1, 3)
    k = k.reshape(B, S, num_heads, dh).transpose(0, 2, 1, 3)
    v = v.reshape(B, S, num_heads, dh).transpose(0, 2, 1, 3)
    s = jnp.einsum("bhqd,bhkd->bhqk", q, k) / jnp.sqrt(dh)
    p = jax.nn.softmax(s, axis=-1)
    a = jnp.einsum("bhqk,bhkd->bhqd", p, v).transpose(0, 2, 1, 3).reshape(B, S, D)
    a = jnp.einsum("bsd,ed->bse", a, params["out_proj_w"]) + params["out_proj_b"][0]
    x1 = x + a
    h2 = ln(x1, params["ln2_w"], params["ln2_b"])
    m = jnp.einsum("bsd,ed->bse", h2, params["fc1_w"]) + params["fc1_b"][0]
    m = jax.nn.gelu(m, approximate=False)
    m = jnp.einsum("bse,de->bsd", m, params["fc2_w"]) + params["fc2_b"][0]
    return x1 + m


def make_params(key, d_model, num_heads, mlp_ratio=4.0):
    dh_mlp = int(d_model * mlp_ratio)
    ks = jax.random.split(key, 8)
    std = 0.02
    return {
        "ln1_w": jnp.ones((1, d_model), jnp.float32),
        "ln1_b": jnp.zeros((1, d_model), jnp.float32),
        "in_proj_w": std * jax.random.normal(ks[0], (3 * d_model, d_model), jnp.float32),
        "in_proj_b": std * jax.random.normal(ks[1], (1, 3 * d_model), jnp.float32),
        "out_proj_w": std * jax.random.normal(ks[2], (d_model, d_model), jnp.float32),
        "out_proj_b": std * jax.random.normal(ks[3], (1, d_model), jnp.float32),
        "ln2_w": jnp.ones((1, d_model), jnp.float32),
        "ln2_b": jnp.zeros((1, d_model), jnp.float32),
        "fc1_w": std * jax.random.normal(ks[4], (dh_mlp, d_model), jnp.float32),
        "fc1_b": std * jax.random.normal(ks[5], (1, dh_mlp), jnp.float32),
        "fc2_w": std * jax.random.normal(ks[6], (d_model, dh_mlp), jnp.float32),
        "fc2_b": std * jax.random.normal(ks[7], (1, d_model), jnp.float32),
    }


if __name__ == "__main__":
    # Small but lane-friendlier demo shapes: D=128 keeps the q/k/v splits 128-aligned.
    B, S, D, H = 2, 16, 128, 4
    key = jax.random.PRNGKey(0)
    kx, kp = jax.random.split(key)
    x = jax.random.normal(kx, (B, S, D), jnp.float32)
    params = make_params(kp, D, H)

    out = jax.block_until_ready(vit_block(x, params, H))
    ref = vit_block_reference(x, params, H)

    assert out.shape == (B, S, D)
    # bf16 MXU operands + approx softmax reciprocal -> looser tolerance than pure f32.
    assert jnp.allclose(out, ref, atol=2e-2, rtol=2e-2), "mismatch vs reference"
    print("KERNEL_OK")
</pallas_src>

<mosaic_0001>
module attributes {stable_mosaic.version = 11 : i64} {
  func.func @vit_block_kernel(%arg0: i32, %arg1: memref<1x16x128xf32, #tpu.memory_space<vmem>>, %arg2: memref<1x128xf32, #tpu.memory_space<vmem>>, %arg3: memref<1x128xf32, #tpu.memory_space<vmem>>, %arg4: memref<128x384xbf16, #tpu.memory_space<vmem>>, %arg5: memref<1x384xf32, #tpu.memory_space<vmem>>, %arg6: memref<128x128xbf16, #tpu.memory_space<vmem>>, %arg7: memref<1x128xf32, #tpu.memory_space<vmem>>, %arg8: memref<1x128xf32, #tpu.memory_space<vmem>>, %arg9: memref<1x128xf32, #tpu.memory_space<vmem>>, %arg10: memref<128x512xbf16, #tpu.memory_space<vmem>>, %arg11: memref<1x512xf32, #tpu.memory_space<vmem>>, %arg12: memref<512x128xbf16, #tpu.memory_space<vmem>>, %arg13: memref<1x128xf32, #tpu.memory_space<vmem>>, %arg14: memref<1x16x128xf32, #tpu.memory_space<vmem>>) attributes {dimension_semantics = [#tpu.dimension_semantics<parallel>], iteration_bounds = array<i64: 2>, scalar_prefetch = 0 : i64, scratch_operands = 0 : i64, tpu.core_type = #tpu.core_type<tc>, window_params = [{transform_indices = @transform_0, window_bounds = array<i64: 1, 16, 128>}, {pipeline_mode = #tpu.pipeline_mode<synchronous>, transform_indices = @transform_1, window_bounds = array<i64: 1, 128>}, {pipeline_mode = #tpu.pipeline_mode<synchronous>, transform_indices = @transform_2, window_bounds = array<i64: 1, 128>}, {pipeline_mode = #tpu.pipeline_mode<synchronous>, transform_indices = @transform_3, window_bounds = array<i64: 128, 384>}, {pipeline_mode = #tpu.pipeline_mode<synchronous>, transform_indices = @transform_4, window_bounds = array<i64: 1, 384>}, {pipeline_mode = #tpu.pipeline_mode<synchronous>, transform_indices = @transform_5, window_bounds = array<i64: 128, 128>}, {pipeline_mode = #tpu.pipeline_mode<synchronous>, transform_indices = @transform_6, window_bounds = array<i64: 1, 128>}, {pipeline_mode = #tpu.pipeline_mode<synchronous>, transform_indices = @transform_7, window_bounds = array<i64: 1, 128>}, {pipeline_mode = #tpu.pipeline_mode<synchronous>, transform_indices = @transform_8, window_bounds = array<i64: 1, 128>}, {pipeline_mode = #tpu.pipeline_mode<synchronous>, transform_indices = @transform_9, window_bounds = array<i64: 128, 512>}, {pipeline_mode = #tpu.pipeline_mode<synchronous>, transform_indices = @transform_10, window_bounds = array<i64: 1, 512>}, {pipeline_mode = #tpu.pipeline_mode<synchronous>, transform_indices = @transform_11, window_bounds = array<i64: 512, 128>}, {pipeline_mode = #tpu.pipeline_mode<synchronous>, transform_indices = @transform_12, window_bounds = array<i64: 1, 128>}, {transform_indices = @transform_13, window_bounds = array<i64: 1, 16, 128>}]} {
    %c0 = arith.constant 0 : index
    %c0_0 = arith.constant 0 : index
    %c0_1 = arith.constant 0 : index
    %0 = vector.load %arg1[%c0, %c0_0, %c0_1] : memref<1x16x128xf32, #tpu.memory_space<vmem>>, vector<1x16x128xf32>
    %1 = vector.shape_cast %0 : vector<1x16x128xf32> to vector<16x128xf32>
    %c0_2 = arith.constant 0 : index
    %c0_3 = arith.constant 0 : index
    %2 = vector.load %arg2[%c0_2, %c0_3] : memref<1x128xf32, #tpu.memory_space<vmem>>, vector<1x128xf32>
    %c0_4 = arith.constant 0 : index
    %c0_5 = arith.constant 0 : index
    %3 = vector.load %arg3[%c0_4, %c0_5] : memref<1x128xf32, #tpu.memory_space<vmem>>, vector<1x128xf32>
    %cst = arith.constant dense<0.000000e+00> : vector<16xf32>
    %4 = vector.multi_reduction <add>, %1, %cst [1] : vector<16x128xf32> to vector<16xf32>
    %5 = vector.shape_cast %4 : vector<16xf32> to vector<16x1xf32>
    %cst_6 = arith.constant 1.280000e+02 : f32
    %6 = vector.broadcast %cst_6 : f32 to vector<16x1xf32>
    %7 = arith.divf %5, %6 : vector<16x1xf32>
    %8 = vector.broadcast %7 : vector<16x1xf32> to vector<16x128xf32>
    %9 = arith.subf %1, %8 : vector<16x128xf32>
    %10 = arith.mulf %9, %9 : vector<16x128xf32>
    %cst_7 = arith.constant dense<0.000000e+00> : vector<16xf32>
    %11 = vector.multi_reduction <add>, %10, %cst_7 [1] : vector<16x128xf32> to vector<16xf32>
    %12 = vector.shape_cast %11 : vector<16xf32> to vector<16x1xf32>
    %cst_8 = arith.constant 1.280000e+02 : f32
    %13 = vector.broadcast %cst_8 : f32 to vector<16x1xf32>
    %14 = arith.divf %12, %13 : vector<16x1xf32>
    %15 = vector.broadcast %7 : vector<16x1xf32> to vector<16x128xf32>
    %16 = arith.subf %1, %15 : vector<16x128xf32>
    %cst_9 = arith.constant 9.99999974E-6 : f32
    %17 = vector.broadcast %cst_9 : f32 to vector<16x1xf32>
    %18 = arith.addf %14, %17 : vector<16x1xf32>
    %19 = math.rsqrt %18 : vector<16x1xf32>
    %20 = vector.broadcast %19 : vector<16x1xf32> to vector<16x128xf32>
    %21 = arith.mulf %16, %20 : vector<16x128xf32>
    %22 = vector.broadcast %2 : vector<1x128xf32> to vector<16x128xf32>
    %23 = arith.mulf %21, %22 : vector<16x128xf32>
    %24 = vector.broadcast %3 : vector<1x128xf32> to vector<16x128xf32>
    %25 = arith.addf %23, %24 : vector<16x128xf32>
    %26 = arith.truncf %25 : vector<16x128xf32> to vector<16x128xbf16>
    %c0_10 = arith.constant 0 : index
    %c0_11 = arith.constant 0 : index
    %27 = vector.load %arg4[%c0_10, %c0_11] : memref<128x384xbf16, #tpu.memory_space<vmem>>, vector<128x384xbf16>
    %cst_12 = arith.constant dense<0.000000e+00> : vector<16x384xf32>
    %28 = tpu.matmul %26, %27, %cst_12 {dimension_numbers = #tpu.dot_dimension_numbers<[1], [0], [0], [1], [0, 0, 1, 1], [], []>} : vector<16x128xbf16>, vector<128x384xbf16>, vector<16x384xf32> -> vector<16x384xf32>
    %c0_13 = arith.constant 0 : index
    %c0_14 = arith.constant 0 : index
    %29 = vector.load %arg5[%c0_13, %c0_14] : memref<1x384xf32, #tpu.memory_space<vmem>>, vector<1x384xf32>
    %30 = vector.broadcast %29 : vector<1x384xf32> to vector<16x384xf32>
    %31 = arith.addf %28, %30 : vector<16x384xf32>
    %32 = vector.extract_strided_slice %31 {offsets = [0, 0], sizes = [16, 128], strides = [1, 1]} : vector<16x384xf32> to vector<16x128xf32>
    %33 = vector.extract_strided_slice %31 {offsets = [0, 128], sizes = [16, 128], strides = [1, 1]} : vector<16x384xf32> to vector<16x128xf32>
    %34 = vector.extract_strided_slice %31 {offsets = [0, 256], sizes = [16, 128], strides = [1, 1]} : vector<16x384xf32> to vector<16x128xf32>
    %cst_15 = arith.constant 0.000000e+00 : f32
    %35 = vector.broadcast %cst_15 : f32 to vector<16x128xf32>
    %36 = vector.extract_strided_slice %32 {offsets = [0, 0], sizes = [16, 32], strides = [1, 1]} : vector<16x128xf32> to vector<16x32xf32>
    %37 = arith.truncf %36 : vector<16x32xf32> to vector<16x32xbf16>
    %38 = vector.extract_strided_slice %33 {offsets = [0, 0], sizes = [16, 32], strides = [1, 1]} : vector<16x128xf32> to vector<16x32xf32>
    %39 = arith.truncf %38 : vector<16x32xf32> to vector<16x32xbf16>
    %40 = vector.extract_strided_slice %34 {offsets = [0, 0], sizes = [16, 32], strides = [1, 1]} : vector<16x128xf32> to vector<16x32xf32>
    %41 = arith.truncf %40 : vector<16x32xf32> to vector<16x32xbf16>
    %cst_16 = arith.constant dense<0.000000e+00> : vector<16x16xf32>
    %42 = tpu.matmul %37, %39, %cst_16 {dimension_numbers = #tpu.dot_dimension_numbers<[1], [1], [0], [0], [0, 0, 1, 0], [], []>} : vector<16x32xbf16>, vector<16x32xbf16>, vector<16x16xf32> -> vector<16x16xf32>
    %cst_17 = arith.constant 0.176776692 : f32
    %43 = vector.broadcast %cst_17 : f32 to vector<16x16xf32>
    %44 = arith.mulf %42, %43 : vector<16x16xf32>
    %cst_18 = arith.constant dense<0xFF800000> : vector<16xf32>
    %45 = vector.multi_reduction <maximumf>, %44, %cst_18 [1] : vector<16x16xf32> to vector<16xf32>
    %46 = vector.shape_cast %45 : vector<16xf32> to vector<16x1xf32>
    %47 = vector.broadcast %46 : vector<16x1xf32> to vector<16x16xf32>
    %48 = arith.subf %44, %47 : vector<16x16xf32>
    %49 = math.exp %48 : vector<16x16xf32>
    %cst_19 = arith.constant dense<0.000000e+00> : vector<16xf32>
    %50 = vector.multi_reduction <add>, %49, %cst_19 [1] : vector<16x16xf32> to vector<16xf32>
    %51 = vector.shape_cast %50 : vector<16xf32> to vector<16x1xf32>
    %52 = tpu.reciprocal %51 {approx = true} : vector<16x1xf32> -> vector<16x1xf32>
    %53 = vector.broadcast %52 : vector<16x1xf32> to vector<16x16xf32>
    %54 = arith.mulf %49, %53 : vector<16x16xf32>
    %55 = arith.truncf %54 : vector<16x16xf32> to vector<16x16xbf16>
    %cst_20 = arith.constant dense<0.000000e+00> : vector<16x32xf32>
    %56 = tpu.matmul %55, %41, %cst_20 {dimension_numbers = #tpu.dot_dimension_numbers<[1], [0], [0], [1], [0, 0, 1, 1], [], []>} : vector<16x16xbf16>, vector<16x32xbf16>, vector<16x32xf32> -> vector<16x32xf32>
    %57 = arith.truncf %56 : vector<16x32xf32> to vector<16x32xbf16>
    %c0_21 = arith.constant 0 : index
    %c0_22 = arith.constant 0 : index
    %58 = vector.load %arg6[%c0_21, %c0_22] : memref<128x128xbf16, #tpu.memory_space<vmem>>, vector<32x128xbf16>
    %cst_23 = arith.constant dense<0.000000e+00> : vector<16x128xf32>
    %59 = tpu.matmul %57, %58, %cst_23 {dimension_numbers = #tpu.dot_dimension_numbers<[1], [0], [0], [1], [0, 0, 1, 1], [], []>} : vector<16x32xbf16>, vector<32x128xbf16>, vector<16x128xf32> -> vector<16x128xf32>
    %60 = arith.addf %35, %59 : vector<16x128xf32>
    %61 = vector.extract_strided_slice %32 {offsets = [0, 32], sizes = [16, 32], strides = [1, 1]} : vector<16x128xf32> to vector<16x32xf32>
    %62 = arith.truncf %61 : vector<16x32xf32> to vector<16x32xbf16>
    %63 = vector.extract_strided_slice %33 {offsets = [0, 32], sizes = [16, 32], strides = [1, 1]} : vector<16x128xf32> to vector<16x32xf32>
    %64 = arith.truncf %63 : vector<16x32xf32> to vector<16x32xbf16>
    %65 = vector.extract_strided_slice %34 {offsets = [0, 32], sizes = [16, 32], strides = [1, 1]} : vector<16x128xf32> to vector<16x32xf32>
    %66 = arith.truncf %65 : vector<16x32xf32> to vector<16x32xbf16>
    %cst_24 = arith.constant dense<0.000000e+00> : vector<16x16xf32>
    %67 = tpu.matmul %62, %64, %cst_24 {dimension_numbers = #tpu.dot_dimension_numbers<[1], [1], [0], [0], [0, 0, 1, 0], [], []>} : vector<16x32xbf16>, vector<16x32xbf16>, vector<16x16xf32> -> vector<16x16xf32>
    %cst_25 = arith.constant 0.176776692 : f32
    %68 = vector.broadcast %cst_25 : f32 to vector<16x16xf32>
    %69 = arith.mulf %67, %68 : vector<16x16xf32>
    %cst_26 = arith.constant dense<0xFF800000> : vector<16xf32>
    %70 = vector.multi_reduction <maximumf>, %69, %cst_26 [1] : vector<16x16xf32> to vector<16xf32>
    %71 = vector.shape_cast %70 : vector<16xf32> to vector<16x1xf32>
    %72 = vector.broadcast %71 : vector<16x1xf32> to vector<16x16xf32>
    %73 = arith.subf %69, %72 : vector<16x16xf32>
    %74 = math.exp %73 : vector<16x16xf32>
    %cst_27 = arith.constant dense<0.000000e+00> : vector<16xf32>
    %75 = vector.multi_reduction <add>, %74, %cst_27 [1] : vector<16x16xf32> to vector<16xf32>
    %76 = vector.shape_cast %75 : vector<16xf32> to vector<16x1xf32>
    %77 = tpu.reciprocal %76 {approx = true} : vector<16x1xf32> -> vector<16x1xf32>
    %78 = vector.broadcast %77 : vector<16x1xf32> to vector<16x16xf32>
    %79 = arith.mulf %74, %78 : vector<16x16xf32>
    %80 = arith.truncf %79 : vector<16x16xf32> to vector<16x16xbf16>
    %cst_28 = arith.constant dense<0.000000e+00> : vector<16x32xf32>
    %81 = tpu.matmul %80, %66, %cst_28 {dimension_numbers = #tpu.dot_dimension_numbers<[1], [0], [0], [1], [0, 0, 1, 1], [], []>} : vector<16x16xbf16>, vector<16x32xbf16>, vector<16x32xf32> -> vector<16x32xf32>
    %82 = arith.truncf %81 : vector<16x32xf32> to vector<16x32xbf16>
    %c32 = arith.constant 32 : index
    %c0_29 = arith.constant 0 : index
    %83 = vector.load %arg6[%c32, %c0_29] : memref<128x128xbf16, #tpu.memory_space<vmem>>, vector<32x128xbf16>
    %cst_30 = arith.constant dense<0.000000e+00> : vector<16x128xf32>
    %84 = tpu.matmul %82, %83, %cst_30 {dimension_numbers = #tpu.dot_dimension_numbers<[1], [0], [0], [1], [0, 0, 1, 1], [], []>} : vector<16x32xbf16>, vector<32x128xbf16>, vector<16x128xf32> -> vector<16x128xf32>
    %85 = arith.addf %60, %84 : vector<16x128xf32>
    %86 = vector.extract_strided_slice %32 {offsets = [0, 64], sizes = [16, 32], strides = [1, 1]} : vector<16x128xf32> to vector<16x32xf32>
    %87 = arith.truncf %86 : vector<16x32xf32> to vector<16x32xbf16>
    %88 = vector.extract_strided_slice %33 {offsets = [0, 64], sizes = [16, 32], strides = [1, 1]} : vector<16x128xf32> to vector<16x32xf32>
    %89 = arith.truncf %88 : vector<16x32xf32> to vector<16x32xbf16>
    %90 = vector.extract_strided_slice %34 {offsets = [0, 64], sizes = [16, 32], strides = [1, 1]} : vector<16x128xf32> to vector<16x32xf32>
    %91 = arith.truncf %90 : vector<16x32xf32> to vector<16x32xbf16>
    %cst_31 = arith.constant dense<0.000000e+00> : vector<16x16xf32>
    %92 = tpu.matmul %87, %89, %cst_31 {dimension_numbers = #tpu.dot_dimension_numbers<[1], [1], [0], [0], [0, 0, 1, 0], [], []>} : vector<16x32xbf16>, vector<16x32xbf16>, vector<16x16xf32> -> vector<16x16xf32>
    %cst_32 = arith.constant 0.176776692 : f32
    %93 = vector.broadcast %cst_32 : f32 to vector<16x16xf32>
    %94 = arith.mulf %92, %93 : vector<16x16xf32>
    %cst_33 = arith.constant dense<0xFF800000> : vector<16xf32>
    %95 = vector.multi_reduction <maximumf>, %94, %cst_33 [1] : vector<16x16xf32> to vector<16xf32>
    %96 = vector.shape_cast %95 : vector<16xf32> to vector<16x1xf32>
    %97 = vector.broadcast %96 : vector<16x1xf32> to vector<16x16xf32>
    %98 = arith.subf %94, %97 : vector<16x16xf32>
    %99 = math.exp %98 : vector<16x16xf32>
    %cst_34 = arith.constant dense<0.000000e+00> : vector<16xf32>
    %100 = vector.multi_reduction <add>, %99, %cst_34 [1] : vector<16x16xf32> to vector<16xf32>
    %101 = vector.shape_cast %100 : vector<16xf32> to vector<16x1xf32>
    %102 = tpu.reciprocal %101 {approx = true} : vector<16x1xf32> -> vector<16x1xf32>
    %103 = vector.broadcast %102 : vector<16x1xf32> to vector<16x16xf32>
    %104 = arith.mulf %99, %103 : vector<16x16xf32>
    %105 = arith.truncf %104 : vector<16x16xf32> to vector<16x16xbf16>
    %cst_35 = arith.constant dense<0.000000e+00> : vector<16x32xf32>
    %106 = tpu.matmul %105, %91, %cst_35 {dimension_numbers = #tpu.dot_dimension_numbers<[1], [0], [0], [1], [0, 0, 1, 1], [], []>} : vector<16x16xbf16>, vector<16x32xbf16>, vector<16x32xf32> -> vector<16x32xf32>
    %107 = arith.truncf %106 : vector<16x32xf32> to vector<16x32xbf16>
    %c64 = arith.constant 64 : index
    %c0_36 = arith.constant 0 : index
    %108 = vector.load %arg6[%c64, %c0_36] : memref<128x128xbf16, #tpu.memory_space<vmem>>, vector<32x128xbf16>
    %cst_37 = arith.constant dense<0.000000e+00> : vector<16x128xf32>
    %109 = tpu.matmul %107, %108, %cst_37 {dimension_numbers = #tpu.dot_dimension_numbers<[1], [0], [0], [1], [0, 0, 1, 1], [], []>} : vector<16x32xbf16>, vector<32x128xbf16>, vector<16x128xf32> -> vector<16x128xf32>
    %110 = arith.addf %85, %109 : vector<16x128xf32>
    %111 = vector.extract_strided_slice %32 {offsets = [0, 96], sizes = [16, 32], strides = [1, 1]} : vector<16x128xf32> to vector<16x32xf32>
    %112 = arith.truncf %111 : vector<16x32xf32> to vector<16x32xbf16>
    %113 = vector.extract_strided_slice %33 {offsets = [0, 96], sizes = [16, 32], strides = [1, 1]} : vector<16x128xf32> to vector<16x32xf32>
    %114 = arith.truncf %113 : vector<16x32xf32> to vector<16x32xbf16>
    %115 = vector.extract_strided_slice %34 {offsets = [0, 96], sizes = [16, 32], strides = [1, 1]} : vector<16x128xf32> to vector<16x32xf32>
    %116 = arith.truncf %115 : vector<16x32xf32> to vector<16x32xbf16>
    %cst_38 = arith.constant dense<0.000000e+00> : vector<16x16xf32>
    %117 = tpu.matmul %112, %114, %cst_38 {dimension_numbers = #tpu.dot_dimension_numbers<[1], [1], [0], [0], [0, 0, 1, 0], [], []>} : vector<16x32xbf16>, vector<16x32xbf16>, vector<16x16xf32> -> vector<16x16xf32>
    %cst_39 = arith.constant 0.176776692 : f32
    %118 = vector.broadcast %cst_39 : f32 to vector<16x16xf32>
    %119 = arith.mulf %117, %118 : vector<16x16xf32>
    %cst_40 = arith.constant dense<0xFF800000> : vector<16xf32>
    %120 = vector.multi_reduction <maximumf>, %119, %cst_40 [1] : vector<16x16xf32> to vector<16xf32>
    %121 = vector.shape_cast %120 : vector<16xf32> to vector<16x1xf32>
    %122 = vector.broadcast %121 : vector<16x1xf32> to vector<16x16xf32>
    %123 = arith.subf %119, %122 : vector<16x16xf32>
    %124 = math.exp %123 : vector<16x16xf32>
    %cst_41 = arith.constant dense<0.000000e+00> : vector<16xf32>
    %125 = vector.multi_reduction <add>, %124, %cst_41 [1] : vector<16x16xf32> to vector<16xf32>
    %126 = vector.shape_cast %125 : vector<16xf32> to vector<16x1xf32>
    %127 = tpu.reciprocal %126 {approx = true} : vector<16x1xf32> -> vector<16x1xf32>
    %128 = vector.broadcast %127 : vector<16x1xf32> to vector<16x16xf32>
    %129 = arith.mulf %124, %128 : vector<16x16xf32>
    %130 = arith.truncf %129 : vector<16x16xf32> to vector<16x16xbf16>
    %cst_42 = arith.constant dense<0.000000e+00> : vector<16x32xf32>
    %131 = tpu.matmul %130, %116, %cst_42 {dimension_numbers = #tpu.dot_dimension_numbers<[1], [0], [0], [1], [0, 0, 1, 1], [], []>} : vector<16x16xbf16>, vector<16x32xbf16>, vector<16x32xf32> -> vector<16x32xf32>
    %132 = arith.truncf %131 : vector<16x32xf32> to vector<16x32xbf16>
    %c96 = arith.constant 96 : index
    %c0_43 = arith.constant 0 : index
    %133 = vector.load %arg6[%c96, %c0_43] : memref<128x128xbf16, #tpu.memory_space<vmem>>, vector<32x128xbf16>
    %cst_44 = arith.constant dense<0.000000e+00> : vector<16x128xf32>
    %134 = tpu.matmul %132, %133, %cst_44 {dimension_numbers = #tpu.dot_dimension_numbers<[1], [0], [0], [1], [0, 0, 1, 1], [], []>} : vector<16x32xbf16>, vector<32x128xbf16>, vector<16x128xf32> -> vector<16x128xf32>
    %135 = arith.addf %110, %134 : vector<16x128xf32>
    %c0_45 = arith.constant 0 : index
    %c0_46 = arith.constant 0 : index
    %136 = vector.load %arg7[%c0_45, %c0_46] : memref<1x128xf32, #tpu.memory_space<vmem>>, vector<1x128xf32>
    %137 = vector.broadcast %136 : vector<1x128xf32> to vector<16x128xf32>
    %138 = arith.addf %135, %137 : vector<16x128xf32>
    %139 = arith.addf %1, %138 : vector<16x128xf32>
    %c0_47 = arith.constant 0 : index
    %c0_48 = arith.constant 0 : index
    %140 = vector.load %arg8[%c0_47, %c0_48] : memref<1x128xf32, #tpu.memory_space<vmem>>, vector<1x128xf32>
    %c0_49 = arith.constant 0 : index
    %c0_50 = arith.constant 0 : index
    %141 = vector.load %arg9[%c0_49, %c0_50] : memref<1x128xf32, #tpu.memory_space<vmem>>, vector<1x128xf32>
    %cst_51 = arith.constant dense<0.000000e+00> : vector<16xf32>
    %142 = vector.multi_reduction <add>, %139, %cst_51 [1] : vector<16x128xf32> to vector<16xf32>
    %143 = vector.shape_cast %142 : vector<16xf32> to vector<16x1xf32>
    %cst_52 = arith.constant 1.280000e+02 : f32
    %144 = vector.broadcast %cst_52 : f32 to vector<16x1xf32>
    %145 = arith.divf %143, %144 : vector<16x1xf32>
    %146 = vector.broadcast %145 : vector<16x1xf32> to vector<16x128xf32>
    %147 = arith.subf %139, %146 : vector<16x128xf32>
    %148 = arith.mulf %147, %147 : vector<16x128xf32>
    %cst_53 = arith.constant dense<0.000000e+00> : vector<16xf32>
    %149 = vector.multi_reduction <add>, %148, %cst_53 [1] : vector<16x128xf32> to vector<16xf32>
    %150 = vector.shape_cast %149 : vector<16xf32> to vector<16x1xf32>
    %cst_54 = arith.constant 1.280000e+02 : f32
    %151 = vector.broadcast %cst_54 : f32 to vector<16x1xf32>
    %152 = arith.divf %150, %151 : vector<16x1xf32>
    %153 = vector.broadcast %145 : vector<16x1xf32> to vector<16x128xf32>
    %154 = arith.subf %139, %153 : vector<16x128xf32>
    %cst_55 = arith.constant 9.99999974E-6 : f32
    %155 = vector.broadcast %cst_55 : f32 to vector<16x1xf32>
    %156 = arith.addf %152, %155 : vector<16x1xf32>
    %157 = math.rsqrt %156 : vector<16x1xf32>
    %158 = vector.broadcast %157 : vector<16x1xf32> to vector<16x128xf32>
    %159 = arith.mulf %154, %158 : vector<16x128xf32>
    %160 = vector.broadcast %140 : vector<1x128xf32> to vector<16x128xf32>
    %161 = arith.mulf %159, %160 : vector<16x128xf32>
    %162 = vector.broadcast %141 : vector<1x128xf32> to vector<16x128xf32>
    %163 = arith.addf %161, %162 : vector<16x128xf32>
    %164 = arith.truncf %163 : vector<16x128xf32> to vector<16x128xbf16>
    %c0_56 = arith.constant 0 : index
    %c0_57 = arith.constant 0 : index
    %165 = vector.load %arg10[%c0_56, %c0_57] : memref<128x512xbf16, #tpu.memory_space<vmem>>, vector<128x512xbf16>
    %cst_58 = arith.constant dense<0.000000e+00> : vector<16x512xf32>
    %166 = tpu.matmul %164, %165, %cst_58 {dimension_numbers = #tpu.dot_dimension_numbers<[1], [0], [0], [1], [0, 0, 1, 1], [], []>} : vector<16x128xbf16>, vector<128x512xbf16>, vector<16x512xf32> -> vector<16x512xf32>
    %c0_59 = arith.constant 0 : index
    %c0_60 = arith.constant 0 : index
    %167 = vector.load %arg11[%c0_59, %c0_60] : memref<1x512xf32, #tpu.memory_space<vmem>>, vector<1x512xf32>
    %168 = vector.broadcast %167 : vector<1x512xf32> to vector<16x512xf32>
    %169 = arith.addf %166, %168 : vector<16x512xf32>
    %cst_61 = arith.constant 5.000000e-01 : f32
    %170 = vector.broadcast %cst_61 : f32 to vector<16x512xf32>
    %171 = arith.mulf %170, %169 : vector<16x512xf32>
    %cst_62 = arith.constant 0.707106769 : f32
    %172 = vector.broadcast %cst_62 : f32 to vector<16x512xf32>
    %173 = arith.mulf %169, %172 : vector<16x512xf32>
    %174 = math.erf %173 : vector<16x512xf32>
    %cst_63 = arith.constant 1.000000e+00 : f32
    %175 = vector.broadcast %cst_63 : f32 to vector<16x512xf32>
    %176 = arith.addf %175, %174 : vector<16x512xf32>
    %177 = arith.mulf %171, %176 : vector<16x512xf32>
    %178 = arith.truncf %177 : vector<16x512xf32> to vector<16x512xbf16>
    %c0_64 = arith.constant 0 : index
    %c0_65 = arith.constant 0 : index
    %179 = vector.load %arg12[%c0_64, %c0_65] : memref<512x128xbf16, #tpu.memory_space<vmem>>, vector<512x128xbf16>
    %cst_66 = arith.constant dense<0.000000e+00> : vector<16x128xf32>
    %180 = tpu.matmul %178, %179, %cst_66 {dimension_numbers = #tpu.dot_dimension_numbers<[1], [0], [0], [1], [0, 0, 1, 1], [], []>} : vector<16x512xbf16>, vector<512x128xbf16>, vector<16x128xf32> -> vector<16x128xf32>
    %c0_67 = arith.constant 0 : index
    %c0_68 = arith.constant 0 : index
    %181 = vector.load %arg13[%c0_67, %c0_68] : memref<1x128xf32, #tpu.memory_space<vmem>>, vector<1x128xf32>
    %182 = vector.broadcast %181 : vector<1x128xf32> to vector<16x128xf32>
    %183 = arith.addf %180, %182 : vector<16x128xf32>
    %184 = arith.addf %139, %183 : vector<16x128xf32>
    %c0_69 = arith.constant 0 : index
    %c0_70 = arith.constant 0 : index
    %c0_71 = arith.constant 0 : index
    %185 = vector.load %arg14[%c0_69, %c0_70, %c0_71] : memref<1x16x128xf32, #tpu.memory_space<vmem>>, vector<1x16x128xf32>
    %186 = vector.shape_cast %185 : vector<1x16x128xf32> to vector<16x128xf32>
    %187 = vector.shape_cast %184 : vector<16x128xf32> to vector<1x16x128xf32>
    tpu.vector_store %arg14[%c0_69, %c0_70, %c0_71], %187 {strides = array<i32>} : memref<1x16x128xf32, #tpu.memory_space<vmem>>, vector<1x16x128xf32>,
    return
  }
  func.func @transform_0(%arg0: i32) -> (i32, i32, i32) {
    %c0_i32 = arith.constant 0 : i32
    %c0_i32_0 = arith.constant 0 : i32
    %c0_i32_1 = arith.constant 0 : i32
    return %arg0, %c0_i32, %c0_i32_0 : i32, i32, i32
  }
  func.func @transform_1(%arg0: i32) -> (i32, i32) {
    %c0_i32 = arith.constant 0 : i32
    %c0_i32_0 = arith.constant 0 : i32
    %c0_i32_1 = arith.constant 0 : i32
    return %c0_i32, %c0_i32_0 : i32, i32
  }
  func.func @transform_2(%arg0: i32) -> (i32, i32) {
    %c0_i32 = arith.constant 0 : i32
    %c0_i32_0 = arith.constant 0 : i32
    %c0_i32_1 = arith.constant 0 : i32
    return %c0_i32, %c0_i32_0 : i32, i32
  }
  func.func @transform_3(%arg0: i32) -> (i32, i32) {
    %c0_i32 = arith.constant 0 : i32
    %c0_i32_0 = arith.constant 0 : i32
    %c0_i32_1 = arith.constant 0 : i32
    return %c0_i32, %c0_i32_0 : i32, i32
  }
  func.func @transform_4(%arg0: i32) -> (i32, i32) {
    %c0_i32 = arith.constant 0 : i32
    %c0_i32_0 = arith.constant 0 : i32
    %c0_i32_1 = arith.constant 0 : i32
    return %c0_i32, %c0_i32_0 : i32, i32
  }
  func.func @transform_5(%arg0: i32) -> (i32, i32) {
    %c0_i32 = arith.constant 0 : i32
    %c0_i32_0 = arith.constant 0 : i32
    %c0_i32_1 = arith.constant 0 : i32
    return %c0_i32, %c0_i32_0 : i32, i32
  }
  func.func @transform_6(%arg0: i32) -> (i32, i32) {
    %c0_i32 = arith.constant 0 : i32
    %c0_i32_0 = arith.constant 0 : i32
    %c0_i32_1 = arith.constant 0 : i32
    return %c0_i32, %c0_i32_0 : i32, i32
  }
  func.func @transform_7(%arg0: i32) -> (i32, i32) {
    %c0_i32 = arith.constant 0 : i32
    %c0_i32_0 = arith.constant 0 : i32
    %c0_i32_1 = arith.constant 0 : i32
    return %c0_i32, %c0_i32_0 : i32, i32
  }
  func.func @transform_8(%arg0: i32) -> (i32, i32) {
    %c0_i32 = arith.constant 0 : i32
    %c0_i32_0 = arith.constant 0 : i32
    %c0_i32_1 = arith.constant 0 : i32
    return %c0_i32, %c0_i32_0 : i32, i32
  }
  func.func @transform_9(%arg0: i32) -> (i32, i32) {
    %c0_i32 = arith.constant 0 : i32
    %c0_i32_0 = arith.constant 0 : i32
    %c0_i32_1 = arith.constant 0 : i32
    return %c0_i32, %c0_i32_0 : i32, i32
  }
  func.func @transform_10(%arg0: i32) -> (i32, i32) {
    %c0_i32 = arith.constant 0 : i32
    %c0_i32_0 = arith.constant 0 : i32
    %c0_i32_1 = arith.constant 0 : i32
    return %c0_i32, %c0_i32_0 : i32, i32
  }
  func.func @transform_11(%arg0: i32) -> (i32, i32) {
    %c0_i32 = arith.constant 0 : i32
    %c0_i32_0 = arith.constant 0 : i32
    %c0_i32_1 = arith.constant 0 : i32
    return %c0_i32, %c0_i32_0 : i32, i32
  }
  func.func @transform_12(%arg0: i32) -> (i32, i32) {
    %c0_i32 = arith.constant 0 : i32
    %c0_i32_0 = arith.constant 0 : i32
    %c0_i32_1 = arith.constant 0 : i32
    return %c0_i32, %c0_i32_0 : i32, i32
  }
  func.func @transform_13(%arg0: i32) -> (i32, i32, i32) {
    %c0_i32 = arith.constant 0 : i32
    %c0_i32_0 = arith.constant 0 : i32
    %c0_i32_1 = arith.constant 0 : i32
    return %arg0, %c0_i32, %c0_i32_0 : i32, i32, i32
  }
}

</mosaic_0001>

<bundles_post_ra>
// kernel: tpu_custom_call.1
= control target key start
LH: loop header
LB: loop body
LE: loop exit
PB: predicated region body
PF: predicated region fallthrough
CT: control target
= control target key end

     0   :  { %s3994_s0 = inlined_call_operand.hbm [shape: f32[2,16,128], index: 0, kind: input, shape index: {}]   ;;  %s3995_s1 = inlined_call_operand.hbm [shape: f32[1,128], index: 1, kind: input, shape index: {}]   ;;  %s3996_s2 = inlined_call_operand.hbm [shape: f32[1,128], index: 2, kind: input, shape index: {}]   ;;  %s3997_s3 = inlined_call_operand.hbm [shape: bf16[128,384], index: 3, kind: input, shape index: {}]   ;;  %s3998_s4 = inlined_call_operand.vmem [shape: f32[1,384], index: 4, kind: input, shape index: {}]   ;;  %s3999_s5 = inlined_call_operand.hbm [shape: bf16[128,128], index: 5, kind: input, shape index: {}]   ;;  %s4000_s6 = inlined_call_operand.vmem [shape: f32[1,128], index: 6, kind: input, shape index: {}]   ;;  %s4001_s7 = inlined_call_operand.vmem [shape: f32[1,128], index: 7, kind: input, shape index: {}]   ;;  %s4002_s8 = inlined_call_operand.vmem [shape: f32[1,128], index: 8, kind: input, shape index: {}]   ;;  %s4003_s9 = inlined_call_operand.hbm [shape: bf16[128,512], index: 9, kind: input, shape index: {}]   ;;  %s4004_s10 = inlined_call_operand.vmem [shape: f32[1,512], index: 10, kind: input, shape index: {}]   ;;  %s4005_s11 = inlined_call_operand.hbm [shape: bf16[512,128], index: 11, kind: input, shape index: {}]   ;;  %s4006_s12 = inlined_call_operand.vmem [shape: f32[1,128], index: 12, kind: input, shape index: {}]   ;;  %s4007_s13 = inlined_call_operand.hbm [shape: f32[2,16,128], index: 13, kind: output, shape index: {}]  }
   0x1   :  { %4012 = sst [smem:[#allocation20_spill]] %s3995_s1 }
   0x2   :  { %4013 = sst [smem:[#allocation21_spill]] %s3997_s3 }
   0x3   :  { %4014 = sst [smem:[#allocation22_spill]] %s4001_s7 }
   0x4   :  { %4015 = sst [smem:[#allocation23_spill]] %s4002_s8 }
   0x5   :  { %4016 = sst [smem:[#allocation24_spill]] %s4004_s10 }
   0x6   :  { %4017 = sst [smem:[#allocation25_spill]] %s4006_s12 }
   0x7   :  { %4018 = sst [smem:[#allocation26_spill]] %s4007_s13 }
   0x8   :  { %18 = vsyncpa [#allocation3], 0 }
   0x9   :  { %20 = vsyncpa [#allocation3 + $0x1], 0 }
   0xa   :  { %21 = vsyncpa [#allocation6], 0 }
   0xb   :  { %22 = vsyncpa [#allocation9], 0 }
   0xc   :  { %23 = vsyncpa [#allocation12], 0 }
   0xd   :  { %24 = vsyncpa [#allocation4], 0 }
   0xe   :  { %26 = vsyncpa [#allocation4 + $0x1], 0  ;;  %s3474_s25 = smov 0   ;;  %s3476_s26 = smov 0  }
   0xf   :  { %s3478_s27 = smov 0   ;;  %s3480_s28 = smov 0  }
  0x10 LB: > { %s3380_s29 = smov [#allocation5]   ;;  %s3495_s14 = sadd.s32 4294967295, %s3378_s28   ;;  %s3378_s28 = sphi %s3480_s28, %s4048_s28   ;;  %s3374_s27 = sphi %s3478_s27, %s4047_s27   ;;  %s3370_s26 = sphi %s3476_s26, %s4046_s26   ;;  %s3366_s25 = sphi %s3474_s25, %s4045_s25  }
  0x11   : > { %s354_s30 = sshll.u32 %s3380_s29, 4  ;;  %p2479_p0 = scmp.ge.s32.totalorder %s3378_s28, 1  ;;  %s3500_s30 = int_to_ptr.vmem [resolvable:$true] %s354_s30 }
  0x12   : > { %p4009_p1 = scmp.eq.s32.totalorder %s3495_s14, 0  ;;  %p341_p2 = scmp.lt.s32.totalorder %s3378_s28, 3 }
  0x13   : > { %s3381_s16 = smov [#allocation8]   ;;  %s3382_s19 = smov [#allocation11]  }
  0x14   : > { %p3502_p3 = pnand %p2479_p0, %p341_p2  ;;  %s375_s17 = sshll.u32 %s3381_s16, 4  ;;  %s3509_s17 = int_to_ptr.vmem [resolvable:$true] %s375_s17 }
  0x15   : > { %s413_s20 = sshll.u32 %s3382_s19, 4  ;;  %s4021_s1 = sld [smem:[#allocation20_spill]]  ;;  %s3517_s20 = int_to_ptr.vmem [resolvable:$true] %s413_s20 }
  0x16   : > { %s4019_s15 = scalar_select %p3502_p3, 1, 0 }
  0x17   : > { %p2829_p5 = pneg %p3502_p3 }
  0x19   : > { %p3513_p6 = pnand %p2829_p5, %p4009_p1 }
  0x1b   : > { %s3102_s23 = scalar_lea.hbm %s4021_s1, 16  ;;  %p3527_p8 = pneg %p3513_p6 }
  0x1c   : > { %p3103_p7 = scmp.ne.s32.totalorder %s4021_s1, %s3102_s23  ;;  %p3109_p11 = scmp.lt.u32.totalorder %s3102_s23, %s4021_s1 }
  0x1e   : > { %p3105_p9 = pnand %p3527_p8, %p3103_p7 }
  0x20   : > { %p3106_p10 = pneg %p3105_p9 }
  0x22   : > { %p3111_p12 = pnand %p3109_p11, %p3106_p10 }
  0x24   : > { %3114 = shalt.err (!%p3111_p12)
}
  0x25   : > { %s3115_s21 = scalar_lea.vmem %s3500_s30, 16  ;;  %s3122_s22 = scalar_lea.vmem %s3500_s30, 32 }
  0x26   : > { %p3116_p13 = scmp.ne.s32.totalorder %s3500_s30, %s3115_s21  ;;  %p3123_p5 = scmp.lt.s32.totalorder %s3500_s30, %s3500_s30 }
  0x27   : > { %p3124_p7 = scmp.lt.s32.totalorder %s3122_s22, %s3115_s21 }
  0x28   : > { %p3118_p0 = pnand %p3116_p13, %p3527_p8 }
  0x29   : > { %p3125_p9 = por %p3124_p7, %p3123_p5 }
  0x2a   : > { %p3119_p2 = pneg %p3118_p0 }
  0x2c   : > { %p3126_p4 = pnand %p3125_p9, %p3119_p2 }
  0x2e   : > { %3129 = shalt.err (!%p3126_p4)
}
  0x2f   : > { %2832 = dma.hbm_to_vmem [thread:$0]  (!%p3513_p6), %s4021_s1, 16, %s3500_s30, [#allocation6]  }
  0x30   : > { %s4023_s3 = sld [smem:[#allocation21_spill]] }
  0x36   : > { %s3130_s19 = scalar_lea.hbm %s4023_s3, 3072 }
  0x37   : > { %p3131_p10 = scmp.ne.s32.totalorder %s4023_s3, %s3130_s19  ;;  %p3137_p4 = scmp.lt.u32.totalorder %s3130_s19, %s4023_s3 }
  0x39   : > { %p3133_p11 = pnand %p3131_p10, %p3527_p8 }
  0x3b   : > { %p3134_p12 = pneg %p3133_p11 }
  0x3d   : > { %p3139_p13 = pnand %p3137_p4, %p3134_p12 }
  0x3f   : > { %3142 = shalt.err (!%p3139_p13)
}
  0x40   : > { %s3143_s30 = scalar_lea.vmem %s3509_s17, 3072  ;;  %p3151_p7 = scmp.lt.s32.totalorder %s3509_s17, %s3509_s17 }
  0x41   : > { %p3144_p0 = scmp.ne.s32.totalorder %s3509_s17, %s3143_s30  ;;  %p3152_p9 = scmp.lt.s32.totalorder %s3143_s30, %s3143_s30 }
  0x43   : > { %p3146_p2 = pnand %p3144_p0, %p3527_p8  ;;  %p3153_p10 = por %p3152_p9, %p3151_p7 }
  0x45   : > { %p3147_p5 = pneg %p3146_p2 }
  0x47   : > { %p3154_p11 = pnand %p3153_p10, %p3147_p5 }
  0x49   : > { %3157 = shalt.err (!%p3154_p11)
}
  0x4a   : > { %s3383_s10 = smov 192   ;;  %s3384_s12 = smov 12  }
  0x4b   : > { %2838 = dma.hbm_to_vmem [thread:$0]  (!%p3513_p6), %s4023_s3, 3072, %s3509_s17, [#allocation9], %s3383_s10, %s3383_s10, %s3384_s12  }
  0x4c   : > { %s3158_s19 = scalar_lea.hbm %s4003_s9, 4096 }
  0x4d   : > { %p3159_p12 = scmp.ne.s32.totalorder %s4003_s9, %s3158_s19  ;;  %p3165_p0 = scmp.lt.u32.totalorder %s3158_s19, %s4003_s9 }
  0x4f   : > { %p3161_p4 = pnand %p3159_p12, %p3527_p8 }
  0x51   : > { %p3162_p13 = pneg %p3161_p4 }
  0x53   : > { %p3167_p2 = pnand %p3165_p0, %p3162_p13 }
  0x55   : > { %3170 = shalt.err (!%p3167_p2)
}
  0x56   : > { %s3171_s17 = scalar_lea.vmem %s3517_s20, 4096  ;;  %p3179_p10 = scmp.lt.s32.totalorder %s3517_s20, %s3517_s20 }
  0x57   : > { %p3172_p5 = scmp.ne.s32.totalorder %s3517_s20, %s3171_s17  ;;  %p3180_p11 = scmp.lt.s32.totalorder %s3171_s17, %s3171_s17 }
  0x59   : > { %p3174_p7 = pnand %p3172_p5, %p3527_p8  ;;  %p3181_p12 = por %p3180_p11, %p3179_p10 }
  0x5b   : > { %p3175_p9 = pneg %p3174_p7 }
  0x5d   : > { %p3182_p4 = pnand %p3181_p12, %p3175_p9 }
  0x5f   : > { %3185 = shalt.err (!%p3182_p4)
}
  0x60   : > { %s3385_s10 = smov 256   ;;  %s3386_s1 = smov 16  }
  0x61   : > { %2844 = dma.hbm_to_vmem [thread:$0]  (!%p3513_p6), %s4003_s9, 4096, %s3517_s20, [#allocation12], %s3385_s10, %s3385_s10, %s3386_s1  }
  0x62   : > { %s3387_s23 = smov [#allocation7]   ;;  %s3388_s29 = smov [#allocation10]  }
  0x63   : > { %s365_s24 = sshll.u32 %s3387_s23, 4  ;;  %s391_s19 = sshll.u32 %s3388_s29, 4  ;;  %s366_s24 = int_to_ptr.vmem [resolvable:$true] %s365_s24  ;;  %s392_s19 = int_to_ptr.vmem [resolvable:$true] %s391_s19 }
  0x64   : > { %s3186_s30 = scalar_lea.hbm %s3996_s2, 16 }
  0x65   : > { %p3187_p13 = scmp.ne.s32.totalorder %s3996_s2, %s3186_s30  ;;  %p3193_p5 = scmp.lt.u32.totalorder %s3186_s30, %s3996_s2 }
  0x67   : > { %p3189_p0 = pnand %p3187_p13, %p3527_p8 }
  0x69   : > { %p3190_p2 = pneg %p3189_p0 }
  0x6b   : > { %p3195_p7 = pnand %p3193_p5, %p3190_p2 }
  0x6d   : > { %3198 = shalt.err (!%p3195_p7)
}
  0x6e   : > { %s3199_s20 = scalar_lea.vmem %s366_s24, 16  ;;  %s3206_s10 = scalar_lea.vmem %s366_s24, 32 }
  0x6f   : > { %p3200_p9 = scmp.ne.s32.totalorder %s366_s24, %s3199_s20  ;;  %p3207_p12 = scmp.lt.s32.totalorder %s366_s24, %s366_s24 }
  0x70   : > { %p3208_p4 = scmp.lt.s32.totalorder %s3206_s10, %s3199_s20 }
  0x71   : > { %p3202_p10 = pnand %p3200_p9, %p3527_p8 }
  0x72   : > { %p3209_p1 = por %p3208_p4, %p3207_p12 }
  0x73   : > { %p3203_p11 = pneg %p3202_p10 }
  0x75   : > { %p3210_p3 = pnand %p3209_p1, %p3203_p11 }
  0x77   : > { %3213 = shalt.err (!%p3210_p3)
}
  0x78   : > { %2835 = dma.hbm_to_vmem [thread:$0]  (!%p3513_p6), %s3996_s2, 16, %s366_s24, [#allocation6]  }
  0x79   : > { %s3214_s12 = scalar_lea.hbm %s3999_s5, 1024 }
  0x7a   : > { %p3215_p13 = scmp.ne.s32.totalorder %s3999_s5, %s3214_s12  ;;  %p3221_p3 = scmp.lt.u32.totalorder %s3214_s12, %s3999_s5 }
  0x7c   : > { %p3217_p0 = pnand %p3215_p13, %p3527_p8 }
  0x7e   : > { %p3218_p1 = pneg %p3217_p0 }
  0x80   : > { %p3223_p2 = pnand %p3221_p3, %p3218_p1 }
  0x82   : > { %3226 = shalt.err (!%p3223_p2)
}
  0x83   : > { %s3227_s22 = scalar_lea.vmem %s392_s19, 1024  ;;  %p3235_p10 = scmp.lt.s32.totalorder %s392_s19, %s392_s19 }
  0x84   : > { %p3228_p5 = scmp.ne.s32.totalorder %s392_s19, %s3227_s22  ;;  %p3236_p11 = scmp.lt.s32.totalorder %s3227_s22, %s3227_s22 }
  0x86   : > { %p3230_p7 = pnand %p3228_p5, %p3527_p8  ;;  %p3237_p12 = por %p3236_p11, %p3235_p10 }
  0x88   : > { %p3231_p9 = pneg %p3230_p7 }
  0x8a   : > { %p3238_p4 = pnand %p3237_p12, %p3231_p9 }
  0x8c   : > { %3241 = shalt.err (!%p3238_p4)
}
  0x8d   : > { %s3389_s24 = smov 64   ;;  %s3390_s30 = smov 4  }
  0x8e   : > { %2841 = dma.hbm_to_vmem [thread:$0]  (!%p3513_p6), %s3999_s5, 1024, %s392_s19, [#allocation9], %s3389_s24, %s3389_s24, %s3390_s30  }
  0x8f   : > { %s3391_s10 = smov [#allocation13]   ;;  %s3242_s8 = scalar_lea.hbm %s4005_s11, 4096 }
  0x90   : > { %s429_s3 = sshll.u32 %s3391_s10, 4  ;;  %p3243_p13 = scmp.ne.s32.totalorder %s4005_s11, %s3242_s8  ;;  %s430_s3 = int_to_ptr.vmem [resolvable:$true] %s429_s3 }
  0x91   : > { %p3249_p3 = scmp.lt.u32.totalorder %s3242_s8, %s4005_s11 }
  0x92   : > { %p3245_p0 = pnand %p3243_p13, %p3527_p8 }
  0x94   : > { %p3246_p1 = pneg %p3245_p0 }
  0x96   : > { %p3251_p2 = pnand %p3249_p3, %p3246_p1 }
  0x98   : > { %3254 = shalt.err (!%p3251_p2)
}
  0x99   : > { %s3255_s19 = scalar_lea.vmem %s430_s3, 4096  ;;  %p3263_p10 = scmp.lt.s32.totalorder %s430_s3, %s430_s3 }
  0x9a   : > { %p3256_p5 = scmp.ne.s32.totalorder %s430_s3, %s3255_s19  ;;  %p3264_p11 = scmp.lt.s32.totalorder %s3255_s19, %s3255_s19 }
  0x9c   : > { %p3258_p7 = pnand %p3256_p5, %p3527_p8  ;;  %p3265_p12 = por %p3264_p11, %p3263_p10 }
  0x9e   : > { %p3259_p9 = pneg %p3258_p7 }
  0xa0   : > { %p3266_p4 = pnand %p3265_p12, %p3259_p9 }
  0xa2   : > { %3269 = shalt.err (!%p3266_p4)
}
  0xa3   : > { %2847 = dma.hbm_to_vmem [thread:$0]  (!%p3513_p6), %s4005_s11, 4096, %s430_s3, [#allocation12], %s3389_s24, %s3389_s24, %s3390_s30  }
  0xa4   : > { %s2478_s16 = sadd.s32 4294967294, %s3378_s28   ;;  %s3651_s18 = sadd.s32 1, %s3378_s28  }
  0xa5   : > { %s36_s17 = ssub.s32 %s3378_s28, %s3651_s18  ;;  %s39_s20 = sadd.s32 1, %s3374_s27 }
  0xa6   : > { %p37_p8 = scmp.eq.s32.totalorder %s36_s17, 0  ;;  %p46_p13 = scmp.ne.s32.totalorder %s3374_s27, %s3370_s26 }
  0xa7   : > { %p47_p0 = scmp.eq.s32.totalorder %s3378_s28, 0  ;;  %p52_p1 = scmp.ne.s32.totalorder %s3370_s26, %s3366_s25 }
  0xa8   : > { %s3662_s10 = scalar_select %p37_p8, %s3374_s27, %s39_s20  }
  0xa9   : > { %p3664_p3 = por %p47_p0, %p46_p13  ;;  %p4025_p2 = scmp.eq.s32.totalorder %s3495_s14, 0 }
  0xaa   : > { %p328_p5 = scmp.eq.s32.totalorder %s3495_s14, 1  ;;  %p334_p7 = scmp.eq.s32.totalorder %s2478_s16, 1 }
  0xab   : > { %p3670_p6 = por %p4025_p2, %p52_p1  ;;  %p2862_p9 = scmp.lt.s32.totalorder %s3378_s28, 2 }
  0xac   : > { %s446_s30 = sand.u32 1, %s3374_s27   ;;  %p3677_p10 = por %p328_p5, %p46_p13 }
  0xad   : > { %p3681_p11 = por %p334_p7, %p52_p1  ;;  %s2487_s8 = sshll.u32 %s446_s30, 4 }
  0xae   : > { %s4027_s3 = scalar_select %p3677_p10, 1, 0 }
  0xaf   : > { %s4028_s7 = scalar_select %p3681_p11, 1, 0 }
  0xb0   : > { %s2618_s12 = sshll.u32 %s3378_s28, 8  ;;  %s450_s19 = scalar_lea.vmem [#allocation2], %s2487_s8 }
  0xb1   : > { %s3689_s29 = scalar_lea.hbm %s3994_s0, %s2618_s12  ;;  %s457_s21 = sshll.u32 %s450_s19, 4  ;;  %s3691_s21 = int_to_ptr.vmem [resolvable:$true] %s457_s21 }
  0xb2   : > { %p3695_p12 = pnand %p2862_p9, %p3664_p3  ;;  %s3699_s16 = scalar_lea.sflag [#allocation3], %s446_s30 }
  0xb3   : > { %s3270_s17 = scalar_lea.hbm %s3689_s29, 256  ;;  %s3275_s1 = scalar_lea.hbm %s3994_s0, 512 }
  0xb4   : > { %p3271_p4 = scmp.ne.s32.totalorder %s3689_s29, %s3270_s17  ;;  %p3272_p8 = pneg %p3695_p12 }
  0xb5   : > { %p3276_p1 = scmp.lt.u32.totalorder %s3689_s29, %s3994_s0  ;;  %p3277_p3 = scmp.lt.u32.totalorder %s3275_s1, %s3270_s17 }
  0xb6   : > { %p3273_p13 = pnand %p3272_p8, %p3271_p4  ;;  %p3279_p5 = scmp.lt.u32.totalorder %s3270_s17, %s3689_s29 }
  0xb7   : > { %p3278_p2 = por %p3277_p3, %p3276_p1 }
  0xb8   : > { %p3274_p0 = pneg %p3273_p13 }
  0xb9   : > { %p3280_p7 = por %p3279_p5, %p3278_p2 }
  0xbb   : > { %p3281_p9 = pnand %p3280_p7, %p3274_p0 }
  0xbd   : > { %3284 = shalt.err (!%p3281_p9)
}
  0xbe   : > { %s3285_s30 = scalar_lea.vmem %s3691_s21, 256  ;;  %s3392_s23 = smov [#allocation2]  }
  0xbf   : > { %p3286_p4 = scmp.ne.s32.totalorder %s3691_s21, %s3285_s30  ;;  %s3290_s19 = sshll.u32 %s3392_s23, 4  ;;  %s3291_s19 = int_to_ptr.vmem [resolvable:$false] %s3290_s19 }
  0xc0   : > { %s3292_s20 = scalar_lea.vmem %s3291_s19, 512  ;;  %p3293_p10 = scmp.lt.s32.totalorder %s3691_s21, %s3291_s19 }
  0xc1   : > { %p3288_p13 = pnand %p3286_p4, %p3272_p8  ;;  %p3294_p1 = scmp.lt.s32.totalorder %s3292_s20, %s3285_s30 }
  0xc3   : > { %p3289_p11 = pneg %p3288_p13  ;;  %p3295_p3 = por %p3294_p1, %p3293_p10 }
  0xc5   : > { %p3296_p2 = pnand %p3295_p3, %p3289_p11 }
  0xc7   : > { %3299 = shalt.err (!%p3296_p2)
}
  0xc8   : > { %s3393_s17 = smov 128   ;;  %s3394_s8 = smov 8  }
  0xc9   : > { %2851 = dma.hbm_to_vmem [thread:$0]  (!%p3695_p12), %s3689_s29, 256, %s3691_s21, %s3699_s16, %s3393_s17, %s3393_s17, %s3394_s8  }
  0xca   : > { %p4030_p8 = scmp.ne.s32.totalorder %s4019_s15, 0 }
  0xcb   : > { %s3730_s1 = sand.u32 (!%p4030_p8), 1, %s3370_s26  }
  0xcc   : > { %469 = sbr.rel (%p4030_p8) target bundleno = 3941 (0xf65), region = 72  ;;  %s2491_s12 = sshll.u32 (!%p4030_p8), %s3730_s1, 4 }
  0xcd   : > { %s472_s13 = scalar_lea.sflag (!%p4030_p8), [#allocation3], %s3730_s1  ;;  %s3736_s30 = scalar_lea.vmem (!%p4030_p8), [#allocation2], %s2491_s12 }
  0xd3   : > { %3345 = dma.done.wait (%p3670_p6), %s472_s13, 256  }
  0xd4   : > { %3347 = vsyncadd (%p3670_p6), %s472_s13, 4294967040  ;;  %p4031_p10 = scmp.eq.s32.totalorder %s3495_s14, 0 }
  0xd6   : > { %3349 = dma.done.wait (%p4031_p10), [#allocation6], 32   ;;  %p4032_p11 = pmov %p4031_p10 }
  0xd7   : > { %p4033_p12 = pmov %p4031_p10 }
  0xd8   : > { %3351 = vsyncadd (%p4032_p11), [#allocation6], 4294967264 }
  0xd9   : > { %3353 = dma.done.wait (%p4033_p12), [#allocation9], 4096   ;;  %p4034_p0 = pmov %p4031_p10 }
  0xdb   : > { %3355 = vsyncadd (%p4034_p0), [#allocation9], 4294963200  ;;  %p4035_p5 = pmov %p4034_p0 }
  0xdc   : > { %p4036_p7 = pmov %p4034_p0 }
  0xdd   : > { %3357 = dma.done.wait (%p4035_p5), [#allocation12], 8192  }
  0xde   : > { %3359 = vsyncadd (%p4036_p7), [#allocation12], 4294959104  ;;  %v543_v0 = vld [vmem:[%s3736_s30] sm:$0xff]  ;;  %v544_v1 = vld [vmem:[%s3736_s30 + $0x8] sm:$0xff]  ;;  %v3395_v4 = vmov 0.0   ;;  %v3396_v30 = vmov 0   ;;  %v621_v53 = vlaneseq }
  0xdf   : > { %547 = vadd.xlane.f32.xlu0 %v543_v0  ;;  %v2924_v2 = vld [vmem:[#allocation8 + $0x4] ss:$12 sps:$4 sm:$0xff]   ;;  %v2926_v3 = vld [vmem:[#allocation8] ss:$12 sps:$4 sm:$0xff]   ;;  %2701 = vmatprep.subr.bf16.mxu1 %v3395_v4  ;;  %v2927_v5 = vld [vmem:[#allocation8 + $0x8] ss:$12 sps:$4 sm:$0xff]  }
  0xe0   : > { %v2928_v6 = vld [vmem:[#allocation8 + $0x1c] ss:$12 sps:$4 sm:$0xff]   ;;  %764 = vmatprep.subr.bf16.mxu0 %v2924_v2  ;;  %2702 = vmatpush3.bf16.msra.mxu1 %v2927_v5  ;;  %v2930_v15 = vld [vmem:[#allocation8 + $0x18] ss:$12 sps:$4 sm:$0xff]   ;;  %v2931_v16 = vld [vmem:[#allocation8 + $0x20] ss:$12 sps:$4 sm:$0xff]  }
  0xe1   : > { %765 = vmatpush1.bf16.msra.mxu0 %v2926_v3  ;;  %2703 = vmatprep.subr.bf16.mxu1 %v3395_v4  ;;  %v2932_v17 = vld [vmem:[#allocation8 + $0x34] ss:$12 sps:$4 sm:$0xff]   ;;  %v2934_v18 = vld [vmem:[#allocation8 + $0x30] ss:$12 sps:$4 sm:$0xff]   ;;  %v2935_v19 = vld [vmem:[#allocation8 + $0x38] ss:$12 sps:$4 sm:$0xff]  }
  0xe2   : > { %766 = vmatprep.subr.bf16.mxu0 %v2928_v6  ;;  %v2936_v20 = vld [vmem:[#allocation8 + $0x4c] ss:$12 sps:$4 sm:$0xff]   ;;  %v2938_v21 = vld [vmem:[#allocation8 + $0x48] ss:$12 sps:$4 sm:$0xff]   ;;  %v2939_v22 = vld [vmem:[#allocation8 + $0x50] ss:$12 sps:$4 sm:$0xff]   ;;  %796 = vmatprep.mubr.bf16.mxu0 %v3396_v30 }
  0xe3   : > { %549 = vadd.xlane.f32.xlu0 %v544_v1  ;;  %v2940_v23 = vld [vmem:[#allocation8 + $0x64] ss:$12 sps:$4 sm:$0xff]   ;;  %v2942_v24 = vld [vmem:[#allocation8 + $0x60] ss:$12 sps:$4 sm:$0xff]   ;;  %v2943_v25 = vld [vmem:[#allocation8 + $0x68] ss:$12 sps:$4 sm:$0xff]  }
  0xe4   : > { %2704 = vmatpush3.bf16.msra.mxu1 %v2931_v16  ;;  %v2944_v26 = vld [vmem:[#allocation8 + $0x7c] ss:$12 sps:$4 sm:$0xff]   ;;  %v2946_v27 = vld [vmem:[#allocation8 + $0x78] ss:$12 sps:$4 sm:$0xff]   ;;  %v2947_v28 = vld [vmem:[#allocation8 + $0x80] ss:$12 sps:$4 sm:$0xff]  }
  0xe5   : > { %767 = vmatpush1.bf16.msra.mxu0 %v2930_v15  ;;  %2705 = vmatprep.subr.bf16.mxu1 %v3395_v4  ;;  %v2948_v29 = vld [vmem:[#allocation8 + $0x94] ss:$12 sps:$4 sm:$0xff]   ;;  %vm3397_vm0 = vmmov 0   ;;  %v2950_v31 = vld [vmem:[#allocation8 + $0x90] ss:$12 sps:$4 sm:$0xff]   ;;  %v3783_v54 = vshrl.u32 %v621_v53, 7 }
  0xe6   : > { %768 = vmatprep.subr.bf16.mxu0 %v2932_v17  ;;  %2717 = vmatprep.mubr.msk.bf16.mxu1 %vm3397_vm0, %v3395_v4  ;;  %v2951_v32 = vld [vmem:[#allocation8 + $0x98] ss:$12 sps:$4 sm:$0xff]   ;;  %v2954_v34 = vld [vmem:[#allocation8 + $0xa8] ss:$12 sps:$4 sm:$0xff]   ;;  %v2955_v35 = vld [vmem:[#allocation8 + $0xb0] ss:$12 sps:$4 sm:$0xff]  }
  0xe7   : > { %v2952_v33 = vld [vmem:[#allocation8 + $0xac] ss:$12 sps:$4 sm:$0xff]   ;;  %v2499_v44 = vld [vmem:[#allocation5] ss:$0 sm:$0xff]  ;;  %v2500_v48 = vld [vmem:[#allocation7] ss:$0 sm:$0xff] }
  0xe8   : > { %2706 = vmatpush3.bf16.msra.mxu1 %v2935_v19  ;;  %v623_v55 = vsub.s32 0, %v3783_v54  ;;  %v631_v56 = vsub.s32 2, %v3783_v54  ;;  %v619_v57 = vld [vmem:[%s3998_s4] sm:$0x7]  ;;  %v627_v58 = vsub.s32 1, %v3783_v54  ;;  %vm851_vm1 = vcmask 261120  }
  0xe9   : > { %769 = vmatpush1.bf16.msra.mxu0 %v2934_v18  ;;  %2707 = vmatprep.subr.bf16.mxu1 %v3395_v4  ;;  %s3398_s29 = smov 96   ;;  %vm901_vm2 = vcmask 130048   ;;  %s3399_s21 = smov 64  }
  0xea   : > { %770 = vmatprep.subr.bf16.mxu0 %v2936_v20  ;;  %v624_v59 = vrot.slane %v619_v57, %v623_v55  ;;  %v632_v60 = vrot.slane %v619_v57, %v631_v56  ;;  %v628_v63 = vrot.slane %v619_v57, %v627_v58  ;;  %s3400_s22 = smov 32   ;;  %s4037_s17 = sld [smem:[#allocation22_spill]] }
  0xeb   : > { %s4040_s16 = sld [smem:[#allocation25_spill]]  ;;  %s541_s23 = scalar_lea.vmem [#allocation14], %s2491_s12 }
  0xec   : > { %2708 = vmatpush3.bf16.msra.mxu1 %v2939_v22  ;;  %s2348_s19 = sshll.u32 %s541_s23, 4  ;;  %s2619_s20 = sshll.u32 %s3495_s14, 8  ;;  %s3944_s19 = int_to_ptr.vmem [resolvable:$true] %s2348_s19 }
  0xed   : > { %771 = vmatpush1.bf16.msra.mxu0 %v2938_v21  ;;  %2709 = vmatprep.subr.bf16.mxu1 %v3395_v4  ;;  %s4041_s13 = sld [smem:[#allocation26_spill]]  ;;  %s2335_s12 = scalar_lea.sflag [#allocation4], %s3730_s1 }
  0xee   : > { %772 = vmatprep.subr.bf16.mxu0 %v2940_v23  ;;  %s3300_s15 = scalar_lea.vmem %s3944_s19, 256  ;;  %p4042_p9 = scmp.ne.s32.totalorder %s4027_s3, 0 }
  0xef   : > { %p3301_p6 = scmp.ne.s32.totalorder %s3944_s19, %s3300_s15  ;;  %s3401_s14 = smov [#allocation14]  }
  0xf0   : > { %2710 = vmatpush3.bf16.msra.mxu1 %v2943_v25  ;;  %s3304_s24 = sshll.u32 %s3401_s14, 4  ;;  %s3305_s24 = int_to_ptr.vmem [resolvable:$false] %s3304_s24 }
  0xf1   : > { %773 = vmatpush1.bf16.msra.mxu0 %v2942_v24  ;;  %2711 = vmatprep.subr.bf16.mxu1 %v3395_v4  ;;  %p3302_p4 = pnand %p3301_p6, %p4042_p9  ;;  %p3307_p1 = scmp.lt.s32.totalorder %s3944_s19, %s3305_s24 }
  0xf2   : > { %774 = vmatprep.subr.bf16.mxu0 %v2944_v26 }
  0xf3   : > { %p3303_p13 = pneg %p3302_p4 }
  0xf4   : > { %2712 = vmatpush3.bf16.msra.mxu1 %v2947_v28 }
  0xf5   : > { %775 = vmatpush1.bf16.msra.mxu0 %v2946_v27  ;;  %2713 = vmatprep.subr.bf16.mxu1 %v3395_v4 }
  0xf6   : > { %776 = vmatprep.subr.bf16.mxu0 %v2948_v29 }
  0xf8   : > { %2714 = vmatpush3.bf16.msra.mxu1 %v2951_v32 }
  0xf9   : > { %777 = vmatpush1.bf16.msra.mxu0 %v2950_v31  ;;  %2715 = vmatprep.subr.bf16.mxu1 %v3395_v4 }
  0xfa   : > { %778 = vmatprep.subr.bf16.mxu0 %v2952_v33 }
  0xfc   : > { %2716 = vmatpush3.bf16.msra.mxu1 %v2955_v35 }
  0xfd   : > { %779 = vmatpush1.bf16.msra.mxu0 %v2954_v34  ;;  %2727 = vmatprep.subr.bf16.mxu1 %v3395_v4 }
  0xfe   : > { %2721 = vmatprep.subr.bf16.mxu0 %v3395_v4 }
 0x16c   : > { %v548_v7 = vpop.xlane.xlu0 %547 }
 0x16d   : > { %v552_v8 = vmul.f32 0.0078125, %v548_v7 }
 0x16f   : > { %v3758_v9 = vsub.f32 %v543_v0, %v552_v8 }
 0x170   : > { %v550_v10 = vpop.xlane.xlu0 %549 }
 0x171   : > { %v553_v11 = vmul.f32 0.0078125, %v550_v10  ;;  %v556_v12 = vmul.f32 %v3758_v9, %v3758_v9 }
 0x173   : > { %v3762_v13 = vsub.f32 %v544_v1, %v553_v11  ;;  %558 = vadd.xlane.f32.xlu1 %v556_v12 }
 0x175   : > { %v557_v14 = vmul.f32 %v3762_v13, %v3762_v13 }
 0x177   : > { %560 = vadd.xlane.f32.xlu1 %v557_v14 }
 0x200   : > { %v559_v36 = vpop.xlane.xlu1 %558 }
 0x201   : > { %v562_v37 = vmul.f32 0.0078125, %v559_v36 }
 0x203   : > { %v564_v38 = vadd.f32 1e-05, %v562_v37 }
 0x204   : > { %v561_v39 = vpop.xlane.xlu1 %560 }
 0x205   : > { %3044 = vrsqrt.f32 %v564_v38  ;;  %v563_v40 = vmul.f32 0.0078125, %v561_v39 }
 0x207   : > { %v565_v41 = vadd.f32 1e-05, %v563_v40 }
 0x209   : > { %3046 = vrsqrt.f32 %v565_v41 }
 0x20f   : > { %v3045_v42 = vpop.eup %3044 }
 0x210   : > { %v568_v43 = vmul.f32 %v3045_v42, %v3758_v9 }
 0x212   : > { %v576_v47 = vmul.f32 %v2499_v44, %v568_v43 }
 0x213   : > { %v3047_v45 = vpop.eup %3046 }
 0x214   : > { %v569_v46 = vmul.f32 %v3047_v45, %v3762_v13  ;;  %v584_v50 = vadd.f32 %v2500_v48, %v576_v47 }
 0x216   : > { %v577_v49 = vmul.f32 %v2499_v44, %v569_v46 }
 0x218   : > { %v585_v51 = vadd.f32 %v2500_v48, %v577_v49 }
 0x21a   : > { %v586_v52 = vpack.c.bf16 %v585_v51, %v584_v50 }
 0x21c   : > { %797 = vmatmul.mubr.bf16.vlgmr.msra.gmra.mrb[0].mxu0 %v586_v52  ;;  %2718 = vmatmul.mubr.bf16.vlgmr.msra.gmra.mrb[0].mxu1 %v586_v52 }
 0x21d   : > { %2723 = vmatprep.mubr.msk.bf16.mxu0 %vm3397_vm0, %v3395_v4  ;;  %2729 = vmatprep.mubr.msk.bf16.mxu1 %vm3397_vm0, %v3395_v4 }
 0x2ef   : > { %v798_v61 = vpop.f32.mrb[0].mxu0  ;;  %v841_v62 = vpop.f32.mrb[0].mxu1 }
 0x2f0   : > { %v800_v0 = vpop.f32.mrb[1].mxu0  ;;  %v2719_v1 = vpop.f32.mrb[1].mxu1  ;;  %v799_v5 = vadd.f32 %v798_v61, %v624_v59  ;;  %v842_v6 = vadd.f32 %v841_v62, %v632_v60 }
 0x2f1   : > { %v802_v2 = vpop.f32.mrb[2].mxu0  ;;  %v844_v3 = vpop.f32.mrb[2].mxu1  ;;  %v801_v11 = vadd.f32 %v800_v0, %v628_v63 }
 0x2f2   : > { %v803_v7 = vadd.f32 %v802_v2, %v624_v59  ;;  %v845_v8 = vadd.f32 %v844_v3, %v632_v60  ;;  %v804_v9 = vpop.f32.mrb[3].mxu0  ;;  %v2720_v10 = vpop.f32.mrb[3].mxu1 }
 0x2f3   : > { %v805_v12 = vadd.f32 %v804_v9, %v628_v63 }
 0x2f4   : > { %v3797_v13 = vpack.c.bf16 %v803_v7, %v799_v5  ;;  %v3799_v14 = vpack.c.bf16 %v845_v8, %v842_v6  ;;  %v2958_v5 = vld [vmem:[#allocation10 + $0x10] sm:$0xff]   ;;  %v2959_v6 = vld [vmem:[#allocation10 + $0x18] sm:$0xff]  }
 0x2f5   : > { %v3801_v15 = vpack.c.bf16 %v805_v12, %v801_v11 }
 0x2f6   : > { %2728 = vmatpush3.bf16.msra.mxu1 %v3799_v14  ;;  %975 = vrot.lane.b32.xlu1 %v3797_v13, %s3398_s29 }
 0x2f7   : > { %978 = vrot.lane.b32.xlu0 %v3801_v15, %s3398_s29  ;;  %v856_v16 = vsel %vm851_vm1, %v3801_v15, 0  ;;  %2739 = vmatprep.subr.bf16.mxu1 %v3395_v4 }
 0x2f8   : > { %2722 = vmatpush3.bf16.xpose.msra.mxu0 %v856_v16 }
 0x2f9   : > { %2733 = vmatprep.subr.bf16.mxu0 %v3395_v4 }
 0x2ff   : > { %2724 = vmatmul.mubr.msk.bf16.vlgmr.msra.gmra.mrb[4].mxu0 %vm851_vm1, %v3797_v13 }
 0x300   : > { %2735 = vmatprep.mubr.msk.bf16.mxu0 %vm3397_vm0, %v3395_v4 }
 0x368   : > { %v976_v19 = vpop.permute.xlu1 %975 }
 0x369   : > { %v979_v17 = vpop.permute.xlu0 %978 }
 0x36a   : > { %v984_v18 = vsel %vm851_vm1, %v979_v17, 0  ;;  %v2956_v17 = vld [vmem:[#allocation10] sm:$0xff]  }
 0x36b   : > { %2734 = vmatpush3.bf16.xpose.msra.mxu0 %v984_v18 }
 0x36c   : > { %2745 = vmatprep.subr.bf16.mxu0 %v3395_v4 }
 0x372   : > { %2736 = vmatmul.mubr.msk.bf16.vlgmr.msra.gmra.mrb[8].mxu0 %vm851_vm1, %v976_v19  ;;  %v2957_v19 = vld [vmem:[#allocation10 + $0x8] sm:$0xff]  }
 0x373   : > { %2749 = vmatprep.mubr.msk.bf16.mxu0 %vm3397_vm0, %v3395_v4  ;;  %2746 = vmatpush3.bf16.msra.mxu0 %v2958_v5 }
 0x374   : > { %2747 = vmatprep.subr.bf16.mxu0 %v3395_v4 }
 0x377   : > { %2748 = vmatpush3.bf16.msra.mxu0 %v2959_v6 }
 0x378   : > { %2761 = vmatprep.subr.bf16.mxu0 %v3395_v4 }
 0x3d2   : > { %v892_v20 = vpop.f32.mrb[4].mxu0 }
 0x3d3   : > { %v899_v21 = vmul.f32 0.17677669, %v892_v20  ;;  %v2725_v22 = vpop.f32.mrb[5].mxu0 }
 0x3d4   : > { %v895_v23 = vpop.f32.mrb[6].mxu0 }
 0x3d5   : > { %v900_v24 = vmul.f32 0.17677669, %v895_v23  ;;  %v2726_v25 = vpop.f32.mrb[7].mxu0  ;;  %v902_v26 = vsel %vm901_vm2, %v899_v21, -inf }
 0x3d6   : > { %903 = vmax.xlane.f32.xlu1 %v902_v26 }
 0x3d7   : > { %v905_v27 = vsel %vm901_vm2, %v900_v24, -inf }
 0x3d8   : > { %906 = vmax.xlane.f32.xlu0 %v905_v27 }
 0x445   : > { %v1020_v28 = vpop.f32.mrb[8].mxu0 }
 0x446   : > { %v1027_v29 = vmul.f32 0.17677669, %v1020_v28  ;;  %v2737_v31 = vpop.f32.mrb[9].mxu0 }
 0x447   : > { %v1023_v32 = vpop.f32.mrb[10].mxu0 }
 0x448   : > { %v1028_v33 = vmul.f32 0.17677669, %v1023_v32  ;;  %v2738_v34 = vpop.f32.mrb[11].mxu0  ;;  %v1029_v35 = vsel %vm901_vm2, %v1027_v29, -inf }
 0x449   : > { %1030 = vmax.xlane.f32.xlu0 %v1029_v35 }
 0x44a   : > { %v1032_v36 = vsel %vm901_vm2, %v1028_v33, -inf }
 0x44b   : > { %1033 = vmax.xlane.f32.xlu1 %v1032_v36 }
 0x463   : > { %v904_v37 = vpop.xlane.xlu1 %903 }
 0x464   : > { %v908_v38 = vsub.f32 %v899_v21, %v904_v37 }
 0x465   : > { %v907_v39 = vpop.xlane.xlu0 %906 }
 0x466   : > { %v910_v40 = vmul.f32 1.442695, %v908_v38  ;;  %v909_v41 = vsub.f32 %v900_v24, %v907_v39 }
 0x468   : > { %3048 = vpow2.f32 %v910_v40  ;;  %v912_v42 = vmul.f32 1.442695, %v909_v41 }
 0x46a   : > { %3050 = vpow2.f32 %v912_v42 }
 0x472   : > { %v3049_v43 = vpop.eup %3048 }
 0x473   : > { %v914_v44 = vsel %vm901_vm2, %v3049_v43, 0.0 }
 0x474   : > { %v3051_v45 = vpop.eup %3050  ;;  %915 = vadd.xlane.f32.xlu0 %v914_v44 }
 0x475   : > { %v917_v46 = vsel %vm901_vm2, %v3051_v45, 0.0 }
 0x476   : > { %918 = vadd.xlane.f32.xlu1 %v917_v46 }
 0x4d6   : > { %v1031_v47 = vpop.xlane.xlu0 %1030 }
 0x4d7   : > { %v1035_v48 = vsub.f32 %v1027_v29, %v1031_v47 }
 0x4d8   : > { %v1034_v49 = vpop.xlane.xlu1 %1033 }
 0x4d9   : > { %v1037_v50 = vmul.f32 1.442695, %v1035_v48  ;;  %v1036_v51 = vsub.f32 %v1028_v33, %v1034_v49 }
 0x4db   : > { %3052 = vpow2.f32 %v1037_v50  ;;  %v1039_v52 = vmul.f32 1.442695, %v1036_v51 }
 0x4dd   : > { %3054 = vpow2.f32 %v1039_v52 }
 0x4e5   : > { %v3053_v53 = vpop.eup %3052 }
 0x4e6   : > { %v1041_v57 = vsel %vm901_vm2, %v3053_v53, 0.0 }
 0x4e7   : > { %v3055_v59 = vpop.eup %3054  ;;  %1042 = vadd.xlane.f32.xlu0 %v1041_v57 }
 0x4e8   : > { %v1044_v60 = vsel %vm901_vm2, %v3055_v59, 0.0 }
 0x4e9   : > { %1045 = vadd.xlane.f32.xlu1 %v1044_v60 }
 0x4fa   : > { %1219 = vrot.lane.b32.xlu1 %v3801_v15, %s3399_s21 }
 0x4fd   : > { %1053 = vrot.lane.b32.xlu0 %v3799_v14, %s3398_s29  ;;  %s4039_s29 = sld [smem:[#allocation24_spill]] }
 0x4fe   : > { %1217 = vrot.lane.b32.xlu1 %v3797_v13, %s3399_s21 }
 0x501   : > { %v916_v61 = vpop.xlane.xlu0 %915 }
 0x502   : > { %3056 = vrcp.f32 %v916_v61 }
 0x503   : > { %v919_v62 = vpop.xlane.xlu1 %918 }
 0x504   : > { %3058 = vrcp.f32 %v919_v62 }
 0x50c   : > { %v3057_v63 = vpop.eup %3056 }
 0x50d   : > { %v922_v1 = vmul.f32 %v3057_v63, %v3049_v43 }
 0x50e   : > { %v3059_v0 = vpop.eup %3058 }
 0x50f   : > { %v923_v2 = vmul.f32 %v3059_v0, %v3051_v45 }
 0x511   : > { %v924_v3 = vpack.c.bf16 %v923_v2, %v922_v1 }
 0x513   : > { %2730 = vmatmul.mubr.msk.bf16.vlgmr.msra.gmra.mrb[4].mxu1 %vm901_vm2, %v924_v3 }
 0x514   : > { %2741 = vmatprep.mubr.msk.bf16.mxu1 %vm3397_vm0, %v3395_v4 }
 0x574   : > { %v1043_v7 = vpop.xlane.xlu0 %1042 }
 0x575   : > { %3060 = vrcp.f32 %v1043_v7 }
 0x576   : > { %v1046_v8 = vpop.xlane.xlu1 %1045 }
 0x577   : > { %3062 = vrcp.f32 %v1046_v8 }
 0x578   : > { %v1054_v9 = vpop.permute.xlu0 %1053 }
 0x579   : > { %2740 = vmatpush3.bf16.msra.mxu1 %v1054_v9 }
 0x57a   : > { %2753 = vmatprep.subr.bf16.mxu1 %v3395_v4  ;;  %v1220_v27 = vpop.permute.xlu1 %1219 }
 0x57b   : > { %v1225_v32 = vsel %vm851_vm1, %v1220_v27, 0 }
 0x57e   : > { %v1218_v33 = vpop.permute.xlu1 %1217 }
 0x57f   : > { %v3061_v10 = vpop.eup %3060 }
 0x580   : > { %v1049_v12 = vmul.f32 %v3061_v10, %v3053_v53 }
 0x581   : > { %v3063_v11 = vpop.eup %3062 }
 0x582   : > { %v1050_v16 = vmul.f32 %v3063_v11, %v3055_v59 }
 0x584   : > { %v1051_v18 = vpack.c.bf16 %v1050_v16, %v1049_v12  ;;  %v2961_v16 = vld [vmem:[#allocation10 + $0x28] sm:$0xff]  }
 0x586   : > { %2742 = vmatmul.mubr.msk.bf16.vlgmr.msra.gmra.mrb[8].mxu1 %vm901_vm2, %v1051_v18 }
 0x587   : > { %2754 = vmatpush3.bf16.msra.mxu1 %v2956_v17  ;;  %2757 = vmatprep.mubr.msk.bf16.mxu1 %vm3397_vm0, %v3395_v4 }
 0x588   : > { %2755 = vmatprep.subr.bf16.mxu1 %v3395_v4 }
 0x58b   : > { %2756 = vmatpush3.bf16.msra.mxu1 %v2957_v19 }
 0x58c   : > { %2767 = vmatprep.subr.bf16.mxu1 %v3395_v4 }
 0x5e6   : > { %v962_v20 = vpop.f32.mrb[4].mxu1 }
 0x5e7   : > { %v2731_v21 = vpop.f32.mrb[5].mxu1 }
 0x5e8   : > { %v965_v22 = vpop.f32.mrb[6].mxu1 }
 0x5e9   : > { %v969_v23 = vpack.c.bf16 %v965_v22, %v962_v20  ;;  %v2732_v24 = vpop.f32.mrb[7].mxu1 }
 0x5eb   : > { %2758 = vmatmul.mubr.msk.bf16.vlgmr.msra.gmra.mrb[12].mxu1 %vm851_vm1, %v969_v23 }
 0x5ec   : > { %2769 = vmatprep.mubr.msk.bf16.mxu1 %vm3397_vm0, %v3395_v4 }
 0x659   : > { %v1093_v25 = vpop.f32.mrb[8].mxu1 }
 0x65a   : > { %v2743_v26 = vpop.f32.mrb[9].mxu1 }
 0x65b   : > { %v1096_v28 = vpop.f32.mrb[10].mxu1 }
 0x65c   : > { %v1100_v29 = vpack.c.bf16 %v1096_v28, %v1093_v25  ;;  %v2744_v31 = vpop.f32.mrb[11].mxu1 }
 0x65e   : > { %2750 = vmatmul.mubr.msk.bf16.vlgmr.msra.gmra.mrb[12].mxu0 %vm851_vm1, %v1100_v29 }
 0x65f   : > { %2762 = vmatpush3.bf16.xpose.msra.mxu0 %v1225_v32  ;;  %2763 = vmatprep.mubr.msk.bf16.mxu0 %vm3397_vm0, %v3395_v4 }
 0x660   : > { %2773 = vmatprep.subr.bf16.mxu0 %v3395_v4 }
 0x666   : > { %2764 = vmatmul.mubr.msk.bf16.vlgmr.msra.gmra.mrb[16].mxu0 %vm851_vm1, %v1218_v33 }
 0x667   : > { %2777 = vmatprep.mubr.msk.bf16.mxu0 %vm3397_vm0, %v3395_v4 }
 0x6be   : > { %v1210_v34 = vpop.f32.mrb[12].mxu1 }
 0x6bf   : > { %v2759_v35 = vpop.f32.mrb[13].mxu1 }
 0x6c0   : > { %v1213_v36 = vpop.f32.mrb[14].mxu1 }
 0x6c1   : > { %v2760_v37 = vpop.f32.mrb[15].mxu1 }
 0x731   : > { %v1154_v38 = vpop.f32.mrb[12].mxu0 }
 0x732   : > { %v3857_v39 = vadd.f32 %v1210_v34, %v1154_v38  ;;  %v2751_v40 = vpop.f32.mrb[13].mxu0 }
 0x733   : > { %v1157_v41 = vpop.f32.mrb[14].mxu0 }
 0x734   : > { %v3859_v42 = vadd.f32 %v1213_v36, %v1157_v41  ;;  %v2752_v43 = vpop.f32.mrb[15].mxu0 }
 0x735   : > { %v2962_v43 = vld [vmem:[#allocation10 + $0x30] sm:$0xff]  }
 0x739   : > { %v1261_v44 = vpop.f32.mrb[16].mxu0 }
 0x73a   : > { %v1268_v45 = vmul.f32 0.17677669, %v1261_v44  ;;  %v2765_v46 = vpop.f32.mrb[17].mxu0 }
 0x73b   : > { %v1264_v47 = vpop.f32.mrb[18].mxu0 }
 0x73c   : > { %v1269_v48 = vmul.f32 0.17677669, %v1264_v47  ;;  %v2766_v49 = vpop.f32.mrb[19].mxu0  ;;  %v1270_v50 = vsel %vm901_vm2, %v1268_v45, -inf }
 0x73d   : > { %1271 = vmax.xlane.f32.xlu1 %v1270_v50 }
 0x73e   : > { %v1273_v51 = vsel %vm901_vm2, %v1269_v48, -inf }
 0x73f   : > { %1274 = vmax.xlane.f32.xlu0 %v1273_v51 }
 0x74e   : > { %1293 = vrot.lane.b32.xlu1 %v3799_v14, %s3399_s21 }
 0x752   : > { %1403 = vrot.lane.b32.xlu1 %v3797_v13, %s3400_s22  ;;  %v2960_v13 = vld [vmem:[#allocation10 + $0x20] sm:$0xff]  }
 0x753   : > { %2774 = vmatpush3.bf16.msra.mxu0 %v2960_v13 }
 0x754   : > { %2775 = vmatprep.subr.bf16.mxu0 %v3395_v4 }
 0x757   : > { %2776 = vmatpush3.bf16.msra.mxu0 %v2961_v16  ;;  %v2967_v16 = vld [vmem:[#allocation11 + $0x8] ss:$16 sps:$4 sm:$0xff]  }
 0x758   : > { %2787 = vmatprep.subr.bf16.mxu0 %v3395_v4 }
 0x7ca   : > { %v1272_v52 = vpop.xlane.xlu1 %1271 }
 0x7cb   : > { %v1276_v53 = vsub.f32 %v1268_v45, %v1272_v52 }
 0x7cc   : > { %v1275_v57 = vpop.xlane.xlu0 %1274 }
 0x7cd   : > { %v1278_v59 = vmul.f32 1.442695, %v1276_v53  ;;  %v1277_v60 = vsub.f32 %v1269_v48, %v1275_v57 }
 0x7ce   : > { %v1294_v61 = vpop.permute.xlu1 %1293 }
 0x7cf   : > { %3064 = vpow2.f32 %v1278_v59  ;;  %v1280_v62 = vmul.f32 1.442695, %v1277_v60  ;;  %2768 = vmatpush3.bf16.msra.mxu1 %v1294_v61 }
 0x7d0   : > { %2781 = vmatprep.subr.bf16.mxu1 %v3395_v4 }
 0x7d1   : > { %3066 = vpow2.f32 %v1280_v62 }
 0x7d9   : > { %v3065_v63 = vpop.eup %3064 }
 0x7da   : > { %v1282_v0 = vsel %vm901_vm2, %v3065_v63, 0.0 }
 0x7db   : > { %v3067_v1 = vpop.eup %3066  ;;  %1283 = vadd.xlane.f32.xlu0 %v1282_v0 }
 0x7dc   : > { %v1285_v2 = vsel %vm901_vm2, %v3067_v1, 0.0 }
 0x7df   : > { %1286 = vadd.xlane.f32.xlu0 %v1285_v2 }
 0x7f5   : > { %1405 = vrot.lane.b32.xlu0 %v3801_v15, %s3400_s22  ;;  %v1404_v15 = vpop.permute.xlu1 %1403 }
 0x868   : > { %v1284_v3 = vpop.xlane.xlu0 %1283 }
 0x869   : > { %3068 = vrcp.f32 %v1284_v3 }
 0x86c   : > { %v1287_v5 = vpop.xlane.xlu0 %1286 }
 0x86d   : > { %3070 = vrcp.f32 %v1287_v5 }
 0x870   : > { %v1406_v10 = vpop.permute.xlu0 %1405 }
 0x871   : > { %v1411_v12 = vsel %vm851_vm1, %v1406_v10, 0 }
 0x873   : > { %v3069_v6 = vpop.eup %3068 }
 0x874   : > { %v1290_v8 = vmul.f32 %v3069_v6, %v3065_v63 }
 0x877   : > { %v3071_v7 = vpop.eup %3070 }
 0x878   : > { %v1291_v9 = vmul.f32 %v3071_v7, %v3067_v1  ;;  %v2545_v1 = vld [vmem:[%s4000_s6] ss:$0 sm:$0xff] }
 0x87a   : > { %v1292_v11 = vpack.c.bf16 %v1291_v9, %v1290_v8  ;;  %v3100_v9 = vld [vmem:[%s3736_s30] sm:$0xff] }
 0x87c   : > { %2770 = vmatmul.mubr.msk.bf16.vlgmr.msra.gmra.mrb[16].mxu1 %vm901_vm2, %v1292_v11  ;;  %v3101_v11 = vld [vmem:[%s3736_s30 + $0x8] sm:$0xff]  ;;  %s4038_s30 = sld [smem:[#allocation23_spill]] }
 0x87d   : > { %2782 = vmatpush3.bf16.xpose.msra.mxu1 %v1411_v12  ;;  %2783 = vmatprep.mubr.msk.bf16.mxu1 %vm3397_vm0, %v3395_v4 }
 0x87e   : > { %2793 = vmatprep.subr.bf16.mxu1 %v3395_v4 }
 0x884   : > { %2784 = vmatmul.mubr.msk.bf16.vlgmr.msra.gmra.mrb[20].mxu1 %vm851_vm1, %v1404_v15  ;;  %v2966_v15 = vld [vmem:[#allocation11 + $0x4] ss:$16 sps:$4 sm:$0xff]  }
 0x885   : > { %2797 = vmatprep.mubr.msk.bf16.mxu1 %vm3397_vm0, %v3395_v4  ;;  %2794 = vmatpush3.bf16.msra.mxu1 %v2962_v43  ;;  %v2988_v43 = vld [vmem:[#allocation11 + $0x80] ss:$16 sps:$4 sm:$0xff]  }
 0x886   : > { %2795 = vmatprep.subr.bf16.mxu1 %v3395_v4 }
 0x94f   : > { %v1333_v17 = vpop.f32.mrb[16].mxu1 }
 0x950   : > { %v2771_v18 = vpop.f32.mrb[17].mxu1 }
 0x951   : > { %v1336_v19 = vpop.f32.mrb[18].mxu1  ;;  %v2972_v18 = vld [vmem:[#allocation11 + $0x24] ss:$16 sps:$4 sm:$0xff]  }
 0x952   : > { %v1340_v20 = vpack.c.bf16 %v1336_v19, %v1333_v17  ;;  %v2772_v21 = vpop.f32.mrb[19].mxu1  ;;  %v2969_v17 = vld [vmem:[#allocation11 + $0xc] ss:$16 sps:$4 sm:$0xff]  }
 0x953   : > { %v2975_v19 = vld [vmem:[#allocation11 + $0x2c] ss:$16 sps:$4 sm:$0xff]   ;;  %v2973_v21 = vld [vmem:[#allocation11 + $0x28] ss:$16 sps:$4 sm:$0xff]  }
 0x954   : > { %2778 = vmatmul.mubr.msk.bf16.vlgmr.msra.gmra.mrb[20].mxu0 %vm851_vm1, %v1340_v20  ;;  %v2970_v20 = vld [vmem:[#allocation11 + $0x20] ss:$16 sps:$4 sm:$0xff]  }
 0x955   : > { %2789 = vmatprep.mubr.msk.bf16.mxu0 %vm3397_vm0, %v3395_v4  ;;  %v2963_v4 = vld [vmem:[#allocation10 + $0x38] sm:$0xff]  }
 0x956   : > { %2796 = vmatpush3.bf16.msra.mxu1 %v2963_v4  ;;  %v3013_v4 = vld [vmem:[#allocation13 + $0xc0] sm:$0xff]  }
 0x957   : > { %v1447_v22 = vpop.f32.mrb[20].mxu1  ;;  %1898 = vmatprep.subr.bf16.mxu1 %v2969_v17  ;;  %v3016_v17 = vld [vmem:[#allocation13 + $0x48] sm:$0xff]  }
 0x958   : > { %v1454_v23 = vmul.f32 0.17677669, %v1447_v22  ;;  %v2785_v24 = vpop.f32.mrb[21].mxu1 }
 0x959   : > { %v1450_v25 = vpop.f32.mrb[22].mxu1 }
 0x95a   : > { %v1455_v26 = vmul.f32 0.17677669, %v1450_v25  ;;  %v2786_v27 = vpop.f32.mrb[23].mxu1  ;;  %v1456_v28 = vsel %vm901_vm2, %v1454_v23, -inf }
 0x95b   : > { %1457 = vmax.xlane.f32.xlu1 %v1456_v28 }
 0x95c   : > { %v1459_v29 = vsel %vm901_vm2, %v1455_v26, -inf }
 0x95d   : > { %1460 = vmax.xlane.f32.xlu0 %v1459_v29 }
 0x9e8   : > { %v1458_v31 = vpop.xlane.xlu1 %1457 }
 0x9e9   : > { %v1462_v32 = vsub.f32 %v1454_v23, %v1458_v31  ;;  %v2978_v31 = vld [vmem:[#allocation11 + $0x44] ss:$16 sps:$4 sm:$0xff]  }
 0x9ea   : > { %v1461_v33 = vpop.xlane.xlu0 %1460 }
 0x9eb   : > { %v1464_v34 = vmul.f32 1.442695, %v1462_v32  ;;  %v1463_v35 = vsub.f32 %v1455_v26, %v1461_v33  ;;  %v2981_v32 = vld [vmem:[#allocation11 + $0x4c] ss:$16 sps:$4 sm:$0xff]   ;;  %v2976_v33 = vld [vmem:[#allocation11 + $0x40] ss:$16 sps:$4 sm:$0xff]  }
 0x9ed   : > { %3072 = vpow2.f32 %v1464_v34  ;;  %v1466_v36 = vmul.f32 1.442695, %v1463_v35  ;;  %v2979_v34 = vld [vmem:[#allocation11 + $0x48] ss:$16 sps:$4 sm:$0xff]   ;;  %v2984_v35 = vld [vmem:[#allocation11 + $0x64] ss:$16 sps:$4 sm:$0xff]  }
 0x9ef   : > { %3074 = vpow2.f32 %v1466_v36  ;;  %v2987_v36 = vld [vmem:[#allocation11 + $0x6c] ss:$16 sps:$4 sm:$0xff]  }
 0x9f7   : > { %v3073_v37 = vpop.eup %3072 }
 0x9f8   : > { %v1468_v38 = vsel %vm901_vm2, %v3073_v37, 0.0 }
 0x9f9   : > { %v3075_v40 = vpop.eup %3074  ;;  %1469 = vadd.xlane.f32.xlu0 %v1468_v38  ;;  %v2985_v38 = vld [vmem:[#allocation11 + $0x68] ss:$16 sps:$4 sm:$0xff]  }
 0x9fa   : > { %v1471_v41 = vsel %vm901_vm2, %v3075_v40, 0.0 }
 0x9fb   : > { %1472 = vadd.xlane.f32.xlu1 %v1471_v41  ;;  %v2993_v41 = vld [vmem:[#allocation11 + $0x8c] ss:$16 sps:$4 sm:$0xff]  }
 0xa0f   : > { %1479 = vrot.lane.b32.xlu0 %v3799_v14, %s3400_s22 }
 0xa27   : > { %v1394_v44 = vpop.f32.mrb[20].mxu0 }
 0xa28   : > { %v1401_v45 = vadd.f32 %v1394_v44, %v3857_v39  ;;  %v2779_v46 = vpop.f32.mrb[21].mxu0  ;;  %v2991_v44 = vld [vmem:[#allocation11 + $0x88] ss:$16 sps:$4 sm:$0xff]  }
 0xa29   : > { %v1397_v47 = vpop.f32.mrb[22].mxu0  ;;  %v2999_v46 = vld [vmem:[#allocation11 + $0xac] ss:$16 sps:$4 sm:$0xff]  }
 0xa2a   : > { %v1402_v48 = vadd.f32 %v1397_v47, %v3859_v42  ;;  %v2780_v49 = vpop.f32.mrb[23].mxu0  ;;  %v2994_v47 = vld [vmem:[#allocation11 + $0xa0] ss:$16 sps:$4 sm:$0xff]  }
 0xa2b   : > { %v3002_v49 = vld [vmem:[#allocation11 + $0xc4] ss:$16 sps:$4 sm:$0xff]  }
 0xa86   : > { %v1470_v50 = vpop.xlane.xlu0 %1469 }
 0xa87   : > { %3076 = vrcp.f32 %v1470_v50  ;;  %v3005_v50 = vld [vmem:[#allocation11 + $0xcc] ss:$16 sps:$4 sm:$0xff]  }
 0xa88   : > { %v1473_v51 = vpop.xlane.xlu1 %1472 }
 0xa89   : > { %3078 = vrcp.f32 %v1473_v51  ;;  %v3000_v51 = vld [vmem:[#allocation11 + $0xc0] ss:$16 sps:$4 sm:$0xff]  }
 0xa8a   : > { %v1480_v52 = vpop.permute.xlu0 %1479 }
 0xa8b   : > { %2788 = vmatpush3.bf16.msra.mxu0 %v1480_v52  ;;  %v3003_v52 = vld [vmem:[#allocation11 + $0xc8] ss:$16 sps:$4 sm:$0xff]  }
 0xa8c   : > { %1855 = vmatprep.subr.bf16.mxu0 %v2966_v15  ;;  %v3015_v15 = vld [vmem:[#allocation13 + $0x80] sm:$0xff]  }
 0xa91   : > { %v3077_v53 = vpop.eup %3076 }
 0xa92   : > { %v1476_v57 = vmul.f32 %v3077_v53, %v3073_v37  ;;  %v2982_v37 = vld [vmem:[#allocation11 + $0x60] ss:$16 sps:$4 sm:$0xff]   ;;  %v3008_v53 = vld [vmem:[#allocation11 + $0xe4] ss:$16 sps:$4 sm:$0xff]  }
 0xa93   : > { %v3079_v14 = vpop.eup %3078 }
 0xa94   : > { %v1477_v59 = vmul.f32 %v3079_v14, %v3075_v40  ;;  %v2990_v40 = vld [vmem:[#allocation11 + $0x84] ss:$16 sps:$4 sm:$0xff]   ;;  %v3011_v14 = vld [vmem:[#allocation11 + $0xec] ss:$16 sps:$4 sm:$0xff]  }
 0xa96   : > { %v1478_v60 = vpack.c.bf16 %v1477_v59, %v1476_v57  ;;  %v3006_v57 = vld [vmem:[#allocation11 + $0xe0] ss:$16 sps:$4 sm:$0xff]   ;;  %v3009_v59 = vld [vmem:[#allocation11 + $0xe8] ss:$16 sps:$4 sm:$0xff]  }
 0xa98   : > { %2790 = vmatmul.mubr.msk.bf16.vlgmr.msra.gmra.mrb[24].mxu0 %vm901_vm2, %v1478_v60  ;;  %v3012_v60 = vld [vmem:[#allocation13 + $0x40] sm:$0xff]  }
 0xa99   : > { %1887 = vmatprep.mubr.bf16.mxu0 %v3396_v30 }
 0xb6b   : > { %v1519_v39 = vpop.f32.mrb[24].mxu0 }
 0xb6c   : > { %v2791_v42 = vpop.f32.mrb[25].mxu0 }
 0xb6d   : > { %v1522_v61 = vpop.f32.mrb[26].mxu0 }
 0xb6e   : > { %v1526_v62 = vpack.c.bf16 %v1522_v61, %v1519_v39  ;;  %v2792_v63 = vpop.f32.mrb[27].mxu0 }
 0xb70   : > { %2798 = vmatmul.mubr.msk.bf16.vlgmr.msra.gmra.mrb[24].mxu1 %vm851_vm1, %v1526_v62 }
 0xb71   : > { %1930 = vmatprep.mubr.bf16.mxu1 %v3396_v30  ;;  %v2964_v30 = vld [vmem:[#allocation11] ss:$16 sps:$4 sm:$0xff]   ;;  %1899 = vmatpush1.bf16.msra.mxu1 %v2967_v16 }
 0xb72   : > { %1856 = vmatpush1.bf16.msra.mxu0 %v2964_v30  ;;  %1900 = vmatprep.subr.bf16.mxu1 %v2975_v19  ;;  %v3014_v30 = vld [vmem:[#allocation13] sm:$0xff]   ;;  %v3018_v19 = vld [vmem:[#allocation13 + $0x8] sm:$0xff]  }
 0xb73   : > { %1857 = vmatprep.subr.bf16.mxu0 %v2972_v18  ;;  %v3017_v18 = vld [vmem:[#allocation13 + $0xc8] sm:$0xff]  }
 0xb75   : > { %1901 = vmatpush1.bf16.msra.mxu1 %v2973_v21  ;;  %v3020_v21 = vld [vmem:[#allocation13 + $0x50] sm:$0xff]  }
 0xb76   : > { %1858 = vmatpush1.bf16.msra.mxu0 %v2970_v20  ;;  %1902 = vmatprep.subr.bf16.mxu1 %v2981_v32  ;;  %v3019_v20 = vld [vmem:[#allocation13 + $0x88] sm:$0xff]   ;;  %v3030_v32 = vld [vmem:[#allocation13 + $0x20] sm:$0xff]  }
 0xb77   : > { %1859 = vmatprep.subr.bf16.mxu0 %v2978_v31  ;;  %v3029_v31 = vld [vmem:[#allocation13 + $0xe0] sm:$0xff]  }
 0xb79   : > { %1903 = vmatpush1.bf16.msra.mxu1 %v2979_v34  ;;  %v3032_v34 = vld [vmem:[#allocation13 + $0x68] sm:$0xff]  }
 0xb7a   : > { %1860 = vmatpush1.bf16.msra.mxu0 %v2976_v33  ;;  %1904 = vmatprep.subr.bf16.mxu1 %v2987_v36  ;;  %v3031_v33 = vld [vmem:[#allocation13 + $0xa0] sm:$0xff]   ;;  %v3034_v36 = vld [vmem:[#allocation13 + $0x28] sm:$0xff]  }
 0xb7b   : > { %1861 = vmatprep.subr.bf16.mxu0 %v2984_v35  ;;  %v3033_v35 = vld [vmem:[#allocation13 + $0xe8] sm:$0xff]  }
 0xb7d   : > { %1905 = vmatpush1.bf16.msra.mxu1 %v2985_v38  ;;  %v3036_v38 = vld [vmem:[#allocation13 + $0x70] sm:$0xff]  }
 0xb7e   : > { %1862 = vmatpush1.bf16.msra.mxu0 %v2982_v37  ;;  %1906 = vmatprep.subr.bf16.mxu1 %v2993_v41  ;;  %v3035_v37 = vld [vmem:[#allocation13 + $0xa8] sm:$0xff]   ;;  %v3038_v41 = vld [vmem:[#allocation13 + $0x30] sm:$0xff]  }
 0xb7f   : > { %1863 = vmatprep.subr.bf16.mxu0 %v2990_v40  ;;  %v3037_v40 = vld [vmem:[#allocation13 + $0xf0] sm:$0xff]  }
 0xb81   : > { %1907 = vmatpush1.bf16.msra.mxu1 %v2991_v44  ;;  %v3040_v44 = vld [vmem:[#allocation13 + $0x78] sm:$0xff]  }
 0xb82   : > { %1864 = vmatpush1.bf16.msra.mxu0 %v2988_v43  ;;  %1908 = vmatprep.subr.bf16.mxu1 %v2999_v46  ;;  %v3039_v43 = vld [vmem:[#allocation13 + $0xb0] sm:$0xff]   ;;  %v3042_v46 = vld [vmem:[#allocation13 + $0x38] sm:$0xff]  }
 0xc43   : > { %v1580_v0 = vpop.f32.mrb[24].mxu1 }
 0xc44   : > { %v1587_v2 = vadd.f32 %v1580_v0, %v1401_v45  ;;  %v2799_v13 = vpop.f32.mrb[25].mxu1  ;;  %v2996_v45 = vld [vmem:[#allocation11 + $0xa4] ss:$16 sps:$4 sm:$0xff]  }
 0xc45   : > { %v1583_v3 = vpop.f32.mrb[26].mxu1  ;;  %1865 = vmatprep.subr.bf16.mxu0 %v2996_v45  ;;  %v2546_v13 = vld [vmem:[%s4037_s17] ss:$0 sm:$0xff] }
 0xc46   : > { %v1596_v5 = vadd.f32 %v2545_v1, %v1587_v2  ;;  %v1588_v6 = vadd.f32 %v1583_v3, %v1402_v48  ;;  %v2800_v7 = vpop.f32.mrb[27].mxu1  ;;  %v2997_v48 = vld [vmem:[#allocation11 + $0xa8] ss:$16 sps:$4 sm:$0xff]   ;;  %1866 = vmatpush1.bf16.msra.mxu0 %v2994_v47 }
 0xc47   : > { %1909 = vmatpush1.bf16.msra.mxu1 %v2997_v48  ;;  %1867 = vmatprep.subr.bf16.mxu0 %v3002_v49  ;;  %v2547_v7 = vld [vmem:[%s4038_s30] ss:$0 sm:$0xff]  ;;  %v1689_v49 = vsub.s32 3, %v3783_v54  ;;  %s3949_s30 = scalar_lea.hbm %s4041_s13, %s2619_s20 }
 0xc48   : > { %v1597_v8 = vadd.f32 %v2545_v1, %v1588_v6  ;;  %v3902_v10 = vadd.f32 %v3100_v9, %v1596_v5  ;;  %1910 = vmatprep.subr.bf16.mxu1 %v3005_v50  ;;  %v3041_v45 = vld [vmem:[#allocation13 + $0xf8] sm:$0xff]  }
 0xc49   : > { %v3043_v47 = vld [vmem:[#allocation13 + $0xb8] sm:$0xff]  }
 0xc4a   : > { %1602 = vadd.xlane.f32.xlu1 %v3902_v10  ;;  %v3906_v12 = vadd.f32 %v3101_v11, %v1597_v8  ;;  %1868 = vmatpush1.bf16.msra.mxu0 %v3000_v51  ;;  %v1673_v48 = vld [vmem:[%s4039_s29] sm:$0xf]  ;;  %s3306_s29 = scalar_lea.vmem %s3305_s24, 512 }
 0xc4b   : > { %1911 = vmatpush1.bf16.msra.mxu1 %v3003_v52  ;;  %1869 = vmatprep.subr.bf16.mxu0 %v3008_v53  ;;  %v1678_v50 = vrot.slane %v1673_v48, %v623_v55  ;;  %v1686_v51 = vrot.slane %v1673_v48, %v631_v56  ;;  %v1682_v52 = vrot.slane %v1673_v48, %v627_v58  ;;  %p3308_p3 = scmp.lt.s32.totalorder %s3306_s29, %s3300_s15 }
 0xc4c   : > { %1912 = vmatprep.subr.bf16.mxu1 %v3011_v14  ;;  %v1690_v53 = vrot.slane %v1673_v48, %v1689_v49 }
 0xc4d   : > { %p3309_p2 = por %p3308_p3, %p3307_p1 }
 0xc4e   : > { %1604 = vadd.xlane.f32.xlu1 %v3906_v12  ;;  %1870 = vmatpush1.bf16.msra.mxu0 %v3006_v57 }
 0xc4f   : > { %1913 = vmatpush1.bf16.msra.mxu1 %v3009_v59  ;;  %2657 = vmatprep.subr.bf16.mxu0 %v3012_v60  ;;  %p3310_p8 = pnand %p3309_p2, %p3303_p13 }
 0xc50   : > { %2679 = vmatprep.subr.bf16.mxu1 %v3013_v4 }
 0xcd7   : > { %v1603_v22 = vpop.xlane.xlu1 %1602 }
 0xcd8   : > { %v1606_v23 = vmul.f32 0.0078125, %v1603_v22  ;;  %v3021_v22 = vld [vmem:[#allocation13 + $0xd0] sm:$0xff]  }
 0xcda   : > { %v3910_v24 = vsub.f32 %v3902_v10, %v1606_v23  ;;  %v3022_v23 = vld [vmem:[#allocation13 + $0x10] sm:$0xff]  }
 0xcdb   : > { %v1605_v25 = vpop.xlane.xlu1 %1604 }
 0xcdc   : > { %v1607_v26 = vmul.f32 0.0078125, %v1605_v25  ;;  %v1610_v27 = vmul.f32 %v3910_v24, %v3910_v24  ;;  %v3024_v25 = vld [vmem:[#allocation13 + $0x58] sm:$0xff]  }
 0xcde   : > { %v3915_v28 = vsub.f32 %v3906_v12, %v1607_v26  ;;  %1612 = vadd.xlane.f32.xlu1 %v1610_v27  ;;  %v3025_v26 = vld [vmem:[#allocation13 + $0xd8] sm:$0xff]  }
 0xcdf   : > { %v3026_v27 = vld [vmem:[#allocation13 + $0x18] sm:$0xff]  }
 0xce0   : > { %v1611_v29 = vmul.f32 %v3915_v28, %v3915_v28 }
 0xce2   : > { %1614 = vadd.xlane.f32.xlu1 %v1611_v29  ;;  %v3028_v29 = vld [vmem:[#allocation13 + $0x60] sm:$0xff]  }
 0xd6b   : > { %v1613_v39 = vpop.xlane.xlu1 %1612 }
 0xd6c   : > { %v1616_v42 = vmul.f32 0.0078125, %v1613_v39 }
 0xd6e   : > { %v1618_v61 = vadd.f32 1e-05, %v1616_v42 }
 0xd6f   : > { %v1615_v62 = vpop.xlane.xlu1 %1614 }
 0xd70   : > { %3080 = vrsqrt.f32 %v1618_v61  ;;  %v1617_v63 = vmul.f32 0.0078125, %v1615_v62 }
 0xd72   : > { %v1619_v0 = vadd.f32 1e-05, %v1617_v63 }
 0xd74   : > { %3082 = vrsqrt.f32 %v1619_v0 }
 0xd7a   : > { %v3081_v1 = vpop.eup %3080 }
 0xd7b   : > { %v1622_v2 = vmul.f32 %v3081_v1, %v3910_v24  ;;  %v3023_v24 = vld [vmem:[#allocation13 + $0x90] sm:$0xff]  }
 0xd7d   : > { %v1630_v6 = vmul.f32 %v2546_v13, %v1622_v2 }
 0xd7e   : > { %v3083_v3 = vpop.eup %3082 }
 0xd7f   : > { %v1623_v5 = vmul.f32 %v3083_v3, %v3915_v28  ;;  %v1638_v9 = vadd.f32 %v2547_v7, %v1630_v6  ;;  %v3027_v28 = vld [vmem:[#allocation13 + $0x98] sm:$0xff]  }
 0xd81   : > { %v1631_v8 = vmul.f32 %v2546_v13, %v1623_v5 }
 0xd83   : > { %v1639_v11 = vadd.f32 %v2547_v7, %v1631_v8 }
 0xd85   : > { %v1640_v16 = vpack.c.bf16 %v1639_v11, %v1638_v9 }
 0xd87   : > { %1888 = vmatmul.mubr.bf16.vlgmr.msra.gmra.mrb[28].mxu0 %v1640_v16  ;;  %1931 = vmatmul.mubr.bf16.vlgmr.msra.gmra.mrb[28].mxu1 %v1640_v16 }
 0xd88   : > { %2658 = vmatpush3.bf16.msra.mxu0 %v3014_v30  ;;  %2680 = vmatpush3.bf16.msra.mxu1 %v3015_v15 }
 0xd89   : > { %2659 = vmatprep.subr.bf16.mxu0 %v3016_v17  ;;  %2681 = vmatprep.subr.bf16.mxu1 %v3017_v18 }
 0xd8c   : > { %2660 = vmatpush3.bf16.msra.mxu0 %v3018_v19  ;;  %2682 = vmatpush3.bf16.msra.mxu1 %v3019_v20 }
 0xd8d   : > { %2661 = vmatprep.subr.bf16.mxu0 %v3020_v21  ;;  %2683 = vmatprep.subr.bf16.mxu1 %v3021_v22 }
 0xd90   : > { %2662 = vmatpush3.bf16.msra.mxu0 %v3022_v23  ;;  %2684 = vmatpush3.bf16.msra.mxu1 %v3023_v24 }
 0xd91   : > { %2663 = vmatprep.subr.bf16.mxu0 %v3024_v25  ;;  %2685 = vmatprep.subr.bf16.mxu1 %v3025_v26 }
 0xd94   : > { %2664 = vmatpush3.bf16.msra.mxu0 %v3026_v27  ;;  %2686 = vmatpush3.bf16.msra.mxu1 %v3027_v28 }
 0xd95   : > { %2665 = vmatprep.subr.bf16.mxu0 %v3028_v29  ;;  %2687 = vmatprep.subr.bf16.mxu1 %v3029_v31 }
 0xd98   : > { %2666 = vmatpush3.bf16.msra.mxu0 %v3030_v32  ;;  %2688 = vmatpush3.bf16.msra.mxu1 %v3031_v33 }
 0xd99   : > { %2667 = vmatprep.subr.bf16.mxu0 %v3032_v34  ;;  %2689 = vmatprep.subr.bf16.mxu1 %v3033_v35 }
 0xd9c   : > { %2668 = vmatpush3.bf16.msra.mxu0 %v3034_v36  ;;  %2690 = vmatpush3.bf16.msra.mxu1 %v3035_v37 }
 0xd9d   : > { %2669 = vmatprep.subr.bf16.mxu0 %v3036_v38  ;;  %2691 = vmatprep.subr.bf16.mxu1 %v3037_v40 }
 0xda0   : > { %2670 = vmatpush3.bf16.msra.mxu0 %v3038_v41  ;;  %2692 = vmatpush3.bf16.msra.mxu1 %v3039_v43 }
 0xda1   : > { %2671 = vmatprep.subr.bf16.mxu0 %v3040_v44  ;;  %2693 = vmatprep.subr.bf16.mxu1 %v3041_v45 }
 0xda4   : > { %2672 = vmatpush3.bf16.msra.mxu0 %v3042_v46  ;;  %2694 = vmatpush3.bf16.msra.mxu1 %v3043_v47 }
 0xe5a   : > { %v1889_v14 = vpop.f32.mrb[28].mxu0  ;;  %v1932_v57 = vpop.f32.mrb[28].mxu1 }
 0xe5b   : > { %v1890_v59 = vadd.f32 %v1889_v14, %v1678_v50  ;;  %v1933_v60 = vadd.f32 %v1932_v57, %v1686_v51  ;;  %v1891_v4 = vpop.f32.mrb[29].mxu0  ;;  %v1934_v39 = vpop.f32.mrb[29].mxu1  ;;  %v2580_v14 = vld [vmem:[%s4040_s16] ss:$0 sm:$0xff] }
 0xe5c   : > { %v1892_v42 = vadd.f32 %v1891_v4, %v1682_v52  ;;  %v1935_v61 = vadd.f32 %v1934_v39, %v1690_v53  ;;  %v1893_v62 = vpop.f32.mrb[30].mxu0  ;;  %v1936_v63 = vpop.f32.mrb[30].mxu1 }
 0xe5d   : > { %v1949_v0 = vmul.f32 0.70710677, %v1890_v59  ;;  %v1951_v1 = vmul.f32 0.70710677, %v1933_v60  ;;  %v1894_v56 = vadd.f32 %v1893_v62, %v1678_v50  ;;  %v1937_v13 = vadd.f32 %v1936_v63, %v1686_v51  ;;  %v1895_v54 = vpop.f32.mrb[31].mxu0  ;;  %v1938_v58 = vpop.f32.mrb[31].mxu1 }
 0xe5e   : > { %v1950_v55 = vmul.f32 0.70710677, %v1892_v42  ;;  %v1952_v2 = vmul.f32 0.70710677, %v1935_v61  ;;  %v1896_v3 = vadd.f32 %v1895_v54, %v1682_v52  ;;  %v1939_v5 = vadd.f32 %v1938_v58, %v1690_v53 }
 0xe5f   : > { %3084 = verf.f32 %v1949_v0  ;;  %v1953_v6 = vmul.f32 0.70710677, %v1894_v56  ;;  %v1955_v7 = vmul.f32 0.70710677, %v1937_v13  ;;  %v1941_v19 = vmul.f32 0.5, %v1890_v59 }
 0xe60   : > { %3086 = verf.f32 %v1951_v1  ;;  %v1954_v8 = vmul.f32 0.70710677, %v1896_v3  ;;  %v1956_v9 = vmul.f32 0.70710677, %v1939_v5  ;;  %v1943_v20 = vmul.f32 0.5, %v1933_v60 }
 0xe61   : > { %3088 = verf.f32 %v1950_v55  ;;  %v1942_v23 = vmul.f32 0.5, %v1892_v42  ;;  %v1945_v25 = vmul.f32 0.5, %v1894_v56  ;;  %v1944_v28 = vmul.f32 0.5, %v1935_v61 }
 0xe62   : > { %3090 = verf.f32 %v1952_v2  ;;  %v1947_v31 = vmul.f32 0.5, %v1937_v13  ;;  %v1946_v36 = vmul.f32 0.5, %v1896_v3  ;;  %v1948_v41 = vmul.f32 0.5, %v1939_v5 }
 0xe63   : > { %3092 = verf.f32 %v1953_v6 }
 0xe64   : > { %3094 = verf.f32 %v1955_v7 }
 0xe65   : > { %3096 = verf.f32 %v1954_v8 }
 0xe66   : > { %3098 = verf.f32 %v1956_v9 }
 0xe69   : > { %v3085_v11 = vpop.eup %3084 }
 0xe6a   : > { %v3087_v30 = vpop.eup %3086  ;;  %v1965_v17 = vadd.f32 1.0, %v3085_v11 }
 0xe6b   : > { %v3089_v15 = vpop.eup %3088  ;;  %v1967_v21 = vadd.f32 1.0, %v3087_v30 }
 0xe6c   : > { %v3091_v16 = vpop.eup %3090  ;;  %v1966_v24 = vadd.f32 1.0, %v3089_v15  ;;  %v1973_v34 = vmul.f32 %v1965_v17, %v1941_v19 }
 0xe6d   : > { %v3093_v18 = vpop.eup %3092  ;;  %v1968_v29 = vadd.f32 1.0, %v3091_v16  ;;  %v1975_v38 = vmul.f32 %v1967_v21, %v1943_v20 }
 0xe6e   : > { %v3095_v22 = vpop.eup %3094  ;;  %v1969_v26 = vadd.f32 1.0, %v3093_v18  ;;  %v1974_v44 = vmul.f32 %v1966_v24, %v1942_v23 }
 0xe6f   : > { %v3097_v27 = vpop.eup %3096  ;;  %v1971_v32 = vadd.f32 1.0, %v3095_v22  ;;  %v1976_v47 = vmul.f32 %v1968_v29, %v1944_v28 }
 0xe70   : > { %v3099_v33 = vpop.eup %3098  ;;  %v1977_v35 = vmul.f32 %v1969_v26, %v1945_v25  ;;  %v1970_v37 = vadd.f32 1.0, %v3097_v27 }
 0xe71   : > { %v1979_v40 = vmul.f32 %v1971_v32, %v1947_v31  ;;  %v1972_v43 = vadd.f32 1.0, %v3099_v33 }
 0xe72   : > { %v1981_v45 = vpack.c.bf16 %v1977_v35, %v1973_v34  ;;  %v1978_v46 = vmul.f32 %v1970_v37, %v1946_v36 }
 0xe73   : > { %v1983_v48 = vpack.c.bf16 %v1979_v40, %v1975_v38  ;;  %v1980_v49 = vmul.f32 %v1972_v43, %v1948_v41 }
 0xe74   : > { %v1982_v50 = vpack.c.bf16 %v1978_v46, %v1974_v44 }
 0xe75   : > { %v1984_v51 = vpack.c.bf16 %v1980_v49, %v1976_v47 }
 0xe76   : > { %2280 = vmatprep.mubr.bf16.mxu0 %v1982_v50 }
 0xe77   : > { %2321 = vmatprep.mubr.bf16.mxu1 %v1984_v51  ;;  %2281 = vmatmul.mubr.bf16.vlgmr.msra.gmra.mrb[32].mxu0 %v1981_v45 }
 0xe78   : > { %2322 = vmatmul.mubr.bf16.vlgmr.msra.gmra.mrb[32].mxu1 %v1983_v48 }
 0xf4a   : > { %v2673_v52 = vpop.f32.mrb[32].mxu0 }
 0xf4b   : > { %v2695_v53 = vpop.f32.mrb[32].mxu1  ;;  %v2674_v57 = vpop.f32.mrb[33].mxu0 }
 0xf4c   : > { %v2675_v59 = vadd.f32 %v2674_v57, %v2673_v52  ;;  %v2696_v60 = vpop.f32.mrb[33].mxu1  ;;  %v2676_v4 = vpop.f32.mrb[34].mxu0 }
 0xf4d   : > { %v2697_v39 = vadd.f32 %v2696_v60, %v2695_v53  ;;  %v2698_v42 = vpop.f32.mrb[34].mxu1  ;;  %v2677_v61 = vpop.f32.mrb[35].mxu0 }
 0xf4e   : > { %v2283_v62 = vadd.f32 %v2675_v59, %v2580_v14  ;;  %v2678_v63 = vadd.f32 %v2677_v61, %v2676_v4  ;;  %v2699_v0 = vpop.f32.mrb[35].mxu1 }
 0xf4f   : > { %v2700_v1 = vadd.f32 %v2699_v0, %v2698_v42 }
 0xf50   : > { %v2324_v55 = vadd.f32 %v2697_v39, %v2283_v62  ;;  %v2286_v2 = vadd.f32 %v2678_v63, %v2580_v14 }
 0xf52   : > { %v2330_v56 = vadd.f32 %v2324_v55, %v3902_v10  ;;  %v2327_v13 = vadd.f32 %v2700_v1, %v2286_v2 }
 0xf54   : > { %2332 = vst [vmem:[%s541_s23] sm:$0xff] %v2330_v56  ;;  %v2331_v54 = vadd.f32 %v2327_v13, %v3906_v12 }
 0xf56   : > { %2333 = vst [vmem:[%s541_s23 + $0x8] sm:$0xff] %v2331_v54 }
 0xf57   : > { %3313 = shalt.err (!%p3310_p8)
}
 0xf58   : > { %s3314_s21 = scalar_lea.hbm %s3949_s30, 256  ;;  %s3318_s23 = scalar_lea.hbm %s4041_s13, 512 }
 0xf59   : > { %p3315_p10 = scmp.ne.s32.totalorder %s3949_s30, %s3314_s21  ;;  %p3319_p0 = scmp.lt.u32.totalorder %s3949_s30, %s4041_s13 }
 0xf5a   : > { %p3320_p5 = scmp.lt.u32.totalorder %s3318_s23, %s3314_s21  ;;  %p3322_p6 = scmp.lt.u32.totalorder %s3314_s21, %s3949_s30 }
 0xf5b   : > { %p3316_p11 = pnand %p3315_p10, %p4042_p9 }
 0xf5c   : > { %p3321_p7 = por %p3320_p5, %p3319_p0 }
 0xf5d   : > { %p3317_p12 = pneg %p3316_p11 }
 0xf5e   : > { %p3323_p4 = por %p3322_p6, %p3321_p7 }
 0xf60   : > { %p3324_p13 = pnand %p3323_p4, %p3317_p12 }
 0xf62   : > { %3327 = shalt.err (!%p3324_p13)
}
 0xf63   : > { %s3402_s8 = smov 128   ;;  %s3403_s15 = smov 8  }
 0xf64   : > { %2827 = dma.vmem_to_hbm [thread:$0]  (%p4042_p9), %s3944_s19, 256, %s3949_s30, %s2335_s12, %s3402_s8, %s3402_s8, %s3403_s15  }
 0xf65 PF: > { %s2363_s14 = sand.u32 1, %s3366_s25   ;;  %p4043_p1 = scmp.ne.s32.totalorder %s4028_s7, 0 }
 0xf66   : > { %p4044_p3 = scmp.ge.s32.totalorder %s3378_s28, 2  ;;  %s2364_s24 = scalar_lea.sflag [#allocation4], %s2363_s14 }
 0xf68   : > { %p2853_p2 = pnand %p4044_p3, %p4043_p1 }
 0xf6a   : > { %3361 = dma.done.wait (!%p2853_p2), %s2364_s24, 256  }
 0xf6b   : > { %3363 = vsyncadd (!%p2853_p2), %s2364_s24, 4294967040  ;;  %p29_p8 = scmp.ge.s32.totalorder %s3651_s18, 4   ;;  %s4045_s25 = smov %s3370_s26 }
 0xf6c   : > { %s4046_s26 = smov %s3374_s27  ;;  %s4047_s27 = smov %s3662_s10 }
 0xf6d   : > { %s4048_s28 = smov %s3651_s18  ;;  %31 = sbr.rel (!%p29_p8) target bundleno = 16 (0x10), region = 141 }
 0xf74   :  { %2369 = vsyncpa [#allocation3], 1 }
 0xf75   :  { %2371 = vsyncpa [#allocation3 + $0x1], 1 }
 0xf76   :  { %2372 = vsyncpa [#allocation6], 1 }
 0xf77   :  { %2373 = vsyncpa [#allocation9], 1 }
 0xf78   :  { %2374 = vsyncpa [#allocation12], 1 }
 0xf79   :  { %2375 = vsyncpa [#allocation4], 1 }
 0xf7a   :  { %2377 = vsyncpa [#allocation4 + $0x1], 1 }

</bundles_post_ra>
